<compile_context>
chip_gen: v5e
topology: v5e:2x2
jax: 0.10.0
libtpu: 0.0.40
codegen_flags: <defaults>
</compile_context>

<pallas_src>
import functools

import jax
import jax.numpy as jnp
from jax.experimental import pallas as pl
from jax.experimental.pallas import tpu as pltpu


# ----------------------------------------------------------------------------------
# small helpers
# ----------------------------------------------------------------------------------
def _round_up(x, m):
    return ((x + m - 1) // m) * m


def _unroll_for(n):
    if n <= 8:
        return True
    if n % 4 == 0:
        return 4
    if n % 2 == 0:
        return 2
    return 1


def _vmem_limit(nbytes):
    est = int(nbytes) * 3 + (2 << 20)           # double-buffering + headroom
    return max(16 << 20, min(64 << 20, est))    # stay within v7x physical VMEM


def _sigmoid(x):
    # sigmoid(x) == 0.5 * tanh(0.5 x) + 0.5 : a single EUP op (cuts EUP pressure vs exp+div).
    return 0.5 * jnp.tanh(0.5 * x) + 0.5


def _lstm_cell(xg, h, c, whh, fused, H):
    """One LSTM cell update.
       xg: input-projection gates (bias already folded):
           fused   -> (B, 4H) with lane-aligned gate slabs (H % 128 == 0)
           unfused -> tuple of 4 per-gate (B, H) arrays
       whh: (H, 4H) fused or tuple of 4 (H, H).  h, c stay f32; MXU operands bf16."""
    hb = h.astype(jnp.bfloat16)
    if fused:
        g = xg + jnp.dot(hb, whh, preferred_element_type=jnp.float32)
        pi = g[:, 0 * H:1 * H]
        pf = g[:, 1 * H:2 * H]
        pg = g[:, 2 * H:3 * H]
        po = g[:, 3 * H:4 * H]
    else:
        wi, wf, wg, wo = whh
        xi, xf, xgg, xo = xg
        pi = xi + jnp.dot(hb, wi, preferred_element_type=jnp.float32)
        pf = xf + jnp.dot(hb, wf, preferred_element_type=jnp.float32)
        pg = xgg + jnp.dot(hb, wg, preferred_element_type=jnp.float32)
        po = xo + jnp.dot(hb, wo, preferred_element_type=jnp.float32)
    i_g = _sigmoid(pi)
    f_g = _sigmoid(pf)
    g_g = jnp.tanh(pg)
    o_g = _sigmoid(po)
    c_new = f_g * c + i_g * g_g
    h_new = o_g * jnp.tanh(c_new)
    return h_new, c_new


# ----------------------------------------------------------------------------------
# Generic LSTM kernel: batch-parallel grid axis, time-chunk pipelined axis
# ----------------------------------------------------------------------------------
def _lstm_kernel(x_ref, h0_ref, c0_ref, len_ref, wih_ref, whh_ref, b_ref,
                 y_ref, hT_ref, cT_ref,
                 h_scr, c_scr, *xp_scr, fused, use_mask, unroll):
    tc = pl.program_id(1)
    n_tc = pl.num_programs(1)
    Tc, Bb, E = x_ref.shape
    H = h0_ref.shape[-1]

    @pl.when(tc == 0)
    def _():
        h_scr[...] = h0_ref[...]
        c_scr[...] = c0_ref[...]

    # ---- hoisted input projection for this time chunk (one MXU matmul, bf16 ops) ----
    x2d = x_ref[...].reshape(Tc * Bb, E)          # layout preserving: Bb % 8 == 0
    gall = jnp.dot(x2d, wih_ref[...], preferred_element_type=jnp.float32) + b_ref[...]
    if fused:
        xp = xp_scr[0]
        xp[...] = gall.reshape(Tc, Bb, 4 * H)
        whh = whh_ref[...]
    else:
        xp_i, xp_f, xp_g, xp_o = xp_scr
        xp_i[...] = gall[:, 0 * H:1 * H].reshape(Tc, Bb, H)
        xp_f[...] = gall[:, 1 * H:2 * H].reshape(Tc, Bb, H)
        xp_g[...] = gall[:, 2 * H:3 * H].reshape(Tc, Bb, H)
        xp_o[...] = gall[:, 3 * H:4 * H].reshape(Tc, Bb, H)
        whh = (whh_ref[0], whh_ref[1], whh_ref[2], whh_ref[3])

    if use_mask:
        lens = len_ref[...]                       # (Bb, 1) int32
        t_base = tc * Tc

    def step(lt, carry):
        h, c = carry
        if fused:
            xg = xp[lt]
        else:
            xg = (xp_i[lt], xp_f[lt], xp_g[lt], xp_o[lt])
        h_new, c_new = _lstm_cell(xg, h, c, whh, fused, H)
        if use_mask:
            mask = (t_base + lt) < lens           # (Bb, 1)
            h_new = jnp.where(mask, h_new, h)
            c_new = jnp.where(mask, c_new, c)
        y_ref[lt] = h_new                         # stays in the VMEM output block
        return h_new, c_new

    h_fin, c_fin = jax.lax.fori_loop(0, Tc, step, (h_scr[...], c_scr[...]),
                                     unroll=unroll)
    h_scr[...] = h_fin
    c_scr[...] = c_fin

    @pl.when(tc == n_tc - 1)
    def _():
        hT_ref[...] = h_fin
        cT_ref[...] = c_fin


def lstm_forward(x_tbe, h0, c0, lens, p, *, use_mask, tc_max=32, bb_max=256):
    """x_tbe: (T, B, E) time-major f32; lens: (B,) / (B,1) int32 valid lengths.
    Returns (y (T,B,H) f32, h_T (B,H), c_T (B,H))."""
    T, B, E = x_tbe.shape
    H = h0.shape[-1]
    fused = (H % 128 == 0)

    # batch padding (multiple of 8 -> layout-preserving in-kernel reshape; batch blocks)
    Bp = _round_up(B, 8)
    bb = Bp if Bp <= bb_max else bb_max
    Bp = _round_up(Bp, bb)

    # time chunking
    if T <= tc_max:
        Tc, Tp = T, T
    else:
        Tc = tc_max
        Tp = _round_up(T, Tc)
    mask_needed = bool(use_mask) or (Tp != T)

    x_pad = jnp.pad(x_tbe, ((0, Tp - T), (0, Bp - B), (0, 0))).astype(jnp.bfloat16)
    h0p = jnp.pad(h0, ((0, Bp - B), (0, 0)))
    c0p = jnp.pad(c0, ((0, Bp - B), (0, 0)))
    lens_arr = jnp.asarray(lens, jnp.int32).reshape(-1, 1)
    lensp = jnp.pad(lens_arr, ((0, Bp - B), (0, 0)))      # padded rows: len 0

    wih = p['wih'].astype(jnp.bfloat16)                   # (E, 4H)
    b = p['b'].astype(jnp.float32)                        # (1, 4H)
    if fused:
        whh = jnp.concatenate([p['whh'][k] for k in range(4)], axis=1).astype(jnp.bfloat16)
        whh_spec = pl.BlockSpec((H, 4 * H), lambda i, j: (0, 0))
        xp_scratch = [pltpu.VMEM((Tc, bb, 4 * H), jnp.float32)]
    else:
        whh = p['whh'].astype(jnp.bfloat16)               # (4, H, H)
        whh_spec = pl.BlockSpec((4, H, H), lambda i, j: (0, 0, 0))
        xp_scratch = [pltpu.VMEM((Tc, bb, H), jnp.float32)] * 4

    est = (Tc * bb * E * 2 + Tc * bb * H * 4 + 6 * bb * H * 4
           + (E * 4 * H + 4 * H * H) * 2 + 4 * H * 4
           + Tc * bb * 4 * H * 4)

    kernel = functools.partial(_lstm_kernel, fused=fused, use_mask=mask_needed,
                               unroll=_unroll_for(Tc))
    y, hT, cT = pl.pallas_call(
        kernel,
        out_shape=(jax.ShapeDtypeStruct((Tp, Bp, H), jnp.float32),
                   jax.ShapeDtypeStruct((Bp, H), jnp.float32),
                   jax.ShapeDtypeStruct((Bp, H), jnp.float32)),
        grid=(Bp // bb, Tp // Tc),
        in_specs=[
            pl.BlockSpec((Tc, bb, E), lambda i, j: (j, i, 0)),   # x chunk
            pl.BlockSpec((bb, H), lambda i, j: (i, 0)),          # h0
            pl.BlockSpec((bb, H), lambda i, j: (i, 0)),          # c0
            pl.BlockSpec((bb, 1), lambda i, j: (i, 0)),          # lengths
            pl.BlockSpec((E, 4 * H), lambda i, j: (0, 0)),       # W_ih (gate order ifgo)
            whh_spec,                                            # W_hh (per-gate or fused)
            pl.BlockSpec((1, 4 * H), lambda i, j: (0, 0)),       # folded bias
        ],
        out_specs=(
            pl.BlockSpec((Tc, bb, H), lambda i, j: (j, i, 0)),   # y chunk (pipelined)
            pl.BlockSpec((bb, H), lambda i, j: (i, 0)),          # final h (revisited)
            pl.BlockSpec((bb, H), lambda i, j: (i, 0)),          # final c (revisited)
        ),
        scratch_shapes=[pltpu.VMEM((bb, H), jnp.float32),
                        pltpu.VMEM((bb, H), jnp.float32)] + xp_scratch,
        compiler_params=pltpu.CompilerParams(
            dimension_semantics=("parallel", "arbitrary"),
            vmem_limit_bytes=_vmem_limit(est)),
    )(x_pad, h0p, c0p, lensp, wih, whh, b)
    return y[:T, :B], hT[:B], cT[:B]


# ----------------------------------------------------------------------------------
# Fused decode chain: sent_decoder (1 step) + word_decoder (L steps) per sentence,
# both weight sets resident, one kernel for the whole chain.
# ----------------------------------------------------------------------------------
def _decode_chain_kernel(xd_ref, hs_ref, cs_ref,
                         wih_s_ref, whh_s_ref, b_s_ref,
                         wih_w_ref, whh_w_ref, b_w_ref,
                         y_ref, *xp_scr, dec_lens, fused):
    Ltot, Bb, E = xd_ref.shape
    H = hs_ref.shape[-1]

    # Hoisted word-decoder input projection for every token of every sentence.
    x2d = xd_ref[...].reshape(Ltot * Bb, E)
    gall = jnp.dot(x2d, wih_w_ref[...], preferred_element_type=jnp.float32) + b_w_ref[...]
    if fused:
        xp = xp_scr[0]
        xp[...] = gall.reshape(Ltot, Bb, 4 * H)
        whh_w = whh_w_ref[...]
        whh_s = whh_s_ref[...]
    else:
        xp_i, xp_f, xp_g, xp_o = xp_scr
        xp_i[...] = gall[:, 0 * H:1 * H].reshape(Ltot, Bb, H)
        xp_f[...] = gall[:, 1 * H:2 * H].reshape(Ltot, Bb, H)
        xp_g[...] = gall[:, 2 * H:3 * H].reshape(Ltot, Bb, H)
        xp_o[...] = gall[:, 3 * H:4 * H].reshape(Ltot, Bb, H)
        whh_w = (whh_w_ref[0], whh_w_ref[1], whh_w_ref[2], whh_w_ref[3])
        whh_s = (whh_s_ref[0], whh_s_ref[1], whh_s_ref[2], whh_s_ref[3])

    wih_s = wih_s_ref[...]
    b_s = b_s_ref[...]

    h_s = hs_ref[...]           # sent_decoder hidden / cell (carried across sentences)
    c_s = cs_ref[...]
    sd_in = hs_ref[...]         # first sent_decoder input = sentence-encoder final h

    off = 0
    for L in dec_lens:                                   # static Python loop over sentences
        # ---- sent_decoder: one LSTM step with input sd_in, state (h_s, c_s) ----
        g_in = jnp.dot(sd_in.astype(jnp.bfloat16), wih_s,
                       preferred_element_type=jnp.float32) + b_s           # (Bb, 4H)
        if fused:
            xg_s = g_in
        else:
            xg_s = (g_in[:, 0 * H:1 * H], g_in[:, 1 * H:2 * H],
                    g_in[:, 2 * H:3 * H], g_in[:, 3 * H:4 * H])
        h_s, c_s = _lstm_cell(xg_s, h_s, c_s, whh_s, fused, H)

        # ---- word_decoder over the L tokens of this sentence (init = sent state) ----
        def wstep(lt, carry, off=off):
            h, c = carry
            t = off + lt
            if fused:
                xg = xp[t]
            else:
                xg = (xp_i[t], xp_f[t], xp_g[t], xp_o[t])
            h_new, c_new = _lstm_cell(xg, h, c, whh_w, fused, H)
            y_ref[t] = h_new
            return h_new, c_new

        h_w, _ = jax.lax.fori_loop(0, L, wstep, (h_s, c_s), unroll=_unroll_for(L))
        sd_in = h_w              # next sent_decoder INPUT is the word_decoder final h
        off += L


def decode_chain(xd, h_sent, c_sent, sent_p, word_p, dec_lens, bb_max=256):
    """xd: (Ltot, B, E) concatenated (time-major) decoder-token embeddings for sentences
    1..S-1; dec_lens: their static lengths.  Returns all word-decoder hiddens (Ltot, B, H)."""
    Ltot, B, E = xd.shape
    H = h_sent.shape[-1]
    fused = (H % 128 == 0)

    Bp = _round_up(B, 8)
    bb = Bp if Bp <= bb_max else bb_max
    Bp = _round_up(Bp, bb)

    xdp = jnp.pad(xd, ((0, 0), (0, Bp - B), (0, 0))).astype(jnp.bfloat16)
    hsp = jnp.pad(h_sent, ((0, Bp - B), (0, 0)))
    csp = jnp.pad(c_sent, ((0, Bp - B), (0, 0)))

    def prep(p):
        wih = p['wih'].astype(jnp.bfloat16)
        b = p['b'].astype(jnp.float32)
        if fused:
            whh = jnp.concatenate([p['whh'][k] for k in range(4)], axis=1).astype(jnp.bfloat16)
            spec = pl.BlockSpec((H, 4 * H), lambda i: (0, 0))
        else:
            whh = p['whh'].astype(jnp.bfloat16)
            spec = pl.BlockSpec((4, H, H), lambda i: (0, 0, 0))
        return wih, whh, b, spec

    wih_s, whh_s, b_s, whh_s_spec = prep(sent_p)
    wih_w, whh_w, b_w, whh_w_spec = prep(word_p)

    if fused:
        xp_scratch = [pltpu.VMEM((Ltot, bb, 4 * H), jnp.float32)]
    else:
        xp_scratch = [pltpu.VMEM((Ltot, bb, H), jnp.float32)] * 4

    est = (Ltot * bb * E * 2 + Ltot * bb * H * 4 + 4 * bb * H * 4
           + (H * 4 * H + E * 4 * H + 8 * H * H) * 2 + 8 * H * 4
           + Ltot * bb * 4 * H * 4)

    kernel = functools.partial(_decode_chain_kernel,
                               dec_lens=tuple(int(L) for L in dec_lens), fused=fused)
    y = pl.pallas_call(
        kernel,
        out_shape=jax.ShapeDtypeStruct((Ltot, Bp, H), jnp.float32),
        grid=(Bp // bb,),
        in_specs=[
            pl.BlockSpec((Ltot, bb, E), lambda i: (0, i, 0)),    # decoder token embeds
            pl.BlockSpec((bb, H), lambda i: (i, 0)),             # sent-encoder final h
            pl.BlockSpec((bb, H), lambda i: (i, 0)),             # sent-encoder final c
            pl.BlockSpec((H, 4 * H), lambda i: (0, 0)),          # sent_decoder W_ih
            whh_s_spec,                                          # sent_decoder W_hh
            pl.BlockSpec((1, 4 * H), lambda i: (0, 0)),          # sent_decoder bias
            pl.BlockSpec((E, 4 * H), lambda i: (0, 0)),          # word_decoder W_ih
            whh_w_spec,                                          # word_decoder W_hh
            pl.BlockSpec((1, 4 * H), lambda i: (0, 0)),          # word_decoder bias
        ],
        out_specs=pl.BlockSpec((Ltot, bb, H), lambda i: (0, i, 0)),
        scratch_shapes=xp_scratch,
        compiler_params=pltpu.CompilerParams(
            dimension_semantics=("parallel",),
            vmem_limit_bytes=_vmem_limit(est)),
    )(xdp, hsp, csp, wih_s, whh_s, b_s, wih_w, whh_w, b_w)
    return y[:, :B]


# ----------------------------------------------------------------------------------
# FC + log_softmax: two-pass (pass 1 = per-row LSE over vocab tiles, pass 2 = log-probs
# per (row, vocab) tile).  The (N, V) output is never resident over the vocab loop.
# ----------------------------------------------------------------------------------
def _fc_lse_kernel(x_ref, w_ref, b_ref, lse_ref, m_scr, l_scr):
    j = pl.program_id(1)
    nj = pl.num_programs(1)

    @pl.when(j == 0)
    def _():
        m_scr[...] = jnp.full_like(m_scr, -jnp.inf)
        l_scr[...] = jnp.zeros_like(l_scr)

    logits = jnp.dot(x_ref[...], w_ref[...],
                     preferred_element_type=jnp.float32) + b_ref[...]      # (tn, tv)
    m_prev = m_scr[...]
    m_new = jnp.maximum(m_prev, jnp.max(logits, axis=-1, keepdims=True))
    l_scr[...] = (l_scr[...] * jnp.exp(m_prev - m_new)
                  + jnp.sum(jnp.exp(logits - m_new), axis=-1, keepdims=True))
    m_scr[...] = m_new

    @pl.when(j == nj - 1)
    def _():
        lse_ref[...] = m_scr[...] + jnp.log(l_scr[...])


def _fc_logp_kernel(x_ref, w_ref, b_ref, lse_ref, o_ref):
    logits = jnp.dot(x_ref[...], w_ref[...],
                     preferred_element_type=jnp.float32) + b_ref[...]
    o_ref[...] = logits - lse_ref[...]


def fc_log_softmax(x, w, b, tn=256, tv=2048):
    """x: (N, H), w: (H, V), b: (V,) -> log_softmax(x @ w + b), (N, V) f32.
    tn=256 matches v6e/v7x 256x256 MXU; use tn=128 on v5e."""
    N, H = x.shape
    V = w.shape[1]
    tn_eff = min(tn, _round_up(N, 8))
    Np = _round_up(N, tn_eff)
    tv_eff = min(tv, _round_up(V, 128))
    Vp = _round_up(V, tv_eff)

    xb = jnp.pad(x, ((0, Np - N), (0, 0))).astype(jnp.bfloat16)
    wb = jnp.pad(w, ((0, 0), (0, Vp - V))).astype(jnp.bfloat16)
    bp = jnp.pad(b.astype(jnp.float32), (0, Vp - V),
                 constant_values=-1e30).reshape(1, Vp)      # padded vocab -> ~zero prob

    grid = (Np // tn_eff, Vp // tv_eff)
    base = tn_eff * H * 2 + H * tv_eff * 2 + tv_eff * 4 + tn_eff * 4

    lse = pl.pallas_call(
        _fc_lse_kernel,
        out_shape=jax.ShapeDtypeStruct((Np, 1), jnp.float32),
        grid=grid,
        in_specs=[pl.BlockSpec((tn_eff, H), lambda i, j: (i, 0)),
                  pl.BlockSpec((H, tv_eff), lambda i, j: (0, j)),
                  pl.BlockSpec((1, tv_eff), lambda i, j: (0, j))],
        out_specs=pl.BlockSpec((tn_eff, 1), lambda i, j: (i, 0)),
        scratch_shapes=[pltpu.VMEM((tn_eff, 1), jnp.float32),
                        pltpu.VMEM((tn_eff, 1), jnp.float32)],
        compiler_params=pltpu.CompilerParams(
            dimension_semantics=("parallel", "arbitrary"),
            vmem_limit_bytes=_vmem_limit(base + 2 * tn_eff * 4)),
    )(xb, wb, bp)

    logp = pl.pallas_call(
        _fc_logp_kernel,
        out_shape=jax.ShapeDtypeStruct((Np, Vp), jnp.float32),
        grid=grid,
        in_specs=[pl.BlockSpec((tn_eff, H), lambda i, j: (i, 0)),
                  pl.BlockSpec((H, tv_eff), lambda i, j: (0, j)),
                  pl.BlockSpec((1, tv_eff), lambda i, j: (0, j)),
                  pl.BlockSpec((tn_eff, 1), lambda i, j: (i, 0))],
        out_specs=pl.BlockSpec((tn_eff, tv_eff), lambda i, j: (i, j)),
        compiler_params=pltpu.CompilerParams(
            dimension_semantics=("parallel", "arbitrary"),
            vmem_limit_bytes=_vmem_limit(base + tn_eff * tv_eff * 4)),
    )(xb, wb, bp, lse)
    return logp[:N, :V]


# ----------------------------------------------------------------------------------
# Parameter init (deterministic, synthetic; gate order i,f,g,o like torch, biases folded)
# ----------------------------------------------------------------------------------
def init_lstm_params(key, input_size, hidden_size):
    k1, k2, k3, k4 = jax.random.split(key, 4)
    s = float(hidden_size) ** -0.5
    wih = jax.random.uniform(k1, (input_size, 4 * hidden_size), jnp.float32, -s, s)
    whh = jax.random.uniform(k2, (4, hidden_size, hidden_size), jnp.float32, -s, s)
    bih = jax.random.uniform(k3, (4 * hidden_size,), jnp.float32, -s, s)
    bhh = jax.random.uniform(k4, (4 * hidden_size,), jnp.float32, -s, s)
    return dict(wih=wih, whh=whh, b=(bih + bhh).reshape(1, -1))


def init_params(key, vocab_size, embed_size, hidden_size):
    ks = jax.random.split(key, 7)
    s = float(hidden_size) ** -0.5
    return dict(
        hidden_size=hidden_size,
        embedding=jax.random.normal(ks[0], (vocab_size, embed_size), jnp.float32) * 0.1,
        word_encoder=init_lstm_params(ks[1], embed_size, hidden_size),
        word_decoder=init_lstm_params(ks[2], embed_size, hidden_size),
        sent_encoder=init_lstm_params(ks[3], hidden_size, hidden_size),
        sent_decoder=init_lstm_params(ks[4], hidden_size, hidden_size),
        fc_w=jax.random.uniform(ks[5], (hidden_size, vocab_size), jnp.float32, -s, s),
        fc_b=jax.random.uniform(ks[6], (vocab_size,), jnp.float32, -s, s),
    )


# ----------------------------------------------------------------------------------
# Full forward (matches BasicHierarchicalEncoderDecoder.forward semantics)
# ----------------------------------------------------------------------------------
def hierarchical_forward(params, word_enc_inputs_list, word_dec_inputs_list):
    B = word_enc_inputs_list[0].shape[0]
    H = params['hidden_size']
    emb = params['embedding']
    S = len(word_enc_inputs_list)

    # ---- word-level encoding: ALL sentences batched into one LSTM call ----
    Lmax = max(int(ids.shape[1]) for ids in word_enc_inputs_list)
    padded = jnp.concatenate(
        [jnp.pad(ids, ((0, 0), (0, Lmax - ids.shape[1]))) for ids in word_enc_inputs_list],
        axis=0)                                                          # (S*B, Lmax)
    enc_lens = jnp.concatenate(
        [jnp.full((ids.shape[0], 1), ids.shape[1], jnp.int32)
         for ids in word_enc_inputs_list], axis=0)                       # (S*B, 1)
    varlen = any(int(ids.shape[1]) != Lmax for ids in word_enc_inputs_list)
    x = jnp.transpose(emb[padded], (1, 0, 2))                            # (Lmax, S*B, E)
    z_big = jnp.zeros((S * B, H), jnp.float32)
    _, h_words, _ = lstm_forward(x, z_big, z_big, enc_lens,
                                 params['word_encoder'], use_mask=varlen)

    # ---- sentence-level encoding over per-sentence final hiddens ----
    sent_x = h_words.reshape(S, B, H)                                    # time-major (S,B,H)
    z = jnp.zeros((B, H), jnp.float32)
    _, h_sent, c_sent = lstm_forward(sent_x, z, z, jnp.full((B, 1), S, jnp.int32),
                                     params['sent_encoder'], use_mask=False)

    # ---- fused decode chain (sent_decoder + word_decoder per sentence, one kernel) ----
    dec_lens = [int(word_dec_inputs_list[i].shape[1])
                for i in range(1, len(word_dec_inputs_list))]
    xd = jnp.concatenate(
        [jnp.transpose(emb[word_dec_inputs_list[i]], (1, 0, 2))
         for i in range(1, len(word_dec_inputs_list))], axis=0)          # (Ltot, B, E)
    y_all = decode_chain(xd, h_sent, c_sent,
                         params['sent_decoder'], params['word_decoder'], dec_lens)

    # ---- ONE batched fc + log_softmax over every decoded token ----
    rows, off = [], 0
    for L in dec_lens:
        rows.append(jnp.transpose(y_all[off:off + L], (1, 0, 2)).reshape(B * L, H))
        off += L
    logp = fc_log_softmax(jnp.concatenate(rows, axis=0), params['fc_w'], params['fc_b'])
    outs, off = [], 0
    for L in dec_lens:
        outs.append(logp[off:off + B * L].reshape(B, L, -1))             # (B, L, vocab)
        off += B * L
    return outs


# ----------------------------------------------------------------------------------
# Pure-JAX reference (mirrors the PyTorch module literally; f32 everywhere)
# ----------------------------------------------------------------------------------
def _lstm_ref(x_tbe, h0, c0, p):
    H = h0.shape[-1]
    wih, whh, b = p['wih'], p['whh'], p['b']

    def step(carry, xt):
        h, c = carry
        g = xt @ wih + b[0]
        pi = g[:, 0 * H:1 * H] + h @ whh[0]
        pf = g[:, 1 * H:2 * H] + h @ whh[1]
        pg = g[:, 2 * H:3 * H] + h @ whh[2]
        po = g[:, 3 * H:4 * H] + h @ whh[3]
        i = jax.nn.sigmoid(pi)
        f = jax.nn.sigmoid(pf)
        gg = jnp.tanh(pg)
        o = jax.nn.sigmoid(po)
        c_new = f * c + i * gg
        h_new = o * jnp.tanh(c_new)
        return (h_new, c_new), h_new

    (h, c), ys = jax.lax.scan(step, (h0, c0), x_tbe)
    return ys, h, c


def hierarchical_forward_ref(params, word_enc_inputs_list, word_dec_inputs_list):
    B = word_enc_inputs_list[0].shape[0]
    H = params['hidden_size']
    emb = params['embedding']
    z = jnp.zeros((B, H), jnp.float32)

    h_list = []
    for ids in word_enc_inputs_list:
        xe = jnp.transpose(emb[ids], (1, 0, 2))
        _, h, _ = _lstm_ref(xe, z, z, params['word_encoder'])
        h_list.append(h)
    sent_x = jnp.stack(h_list, axis=0)                                   # (S, B, H)
    _, h_s, c_s = _lstm_ref(sent_x, z, z, params['sent_encoder'])

    sd_in = h_s[None]
    outs = []
    for i in range(1, len(word_dec_inputs_list)):
        _, h_s, c_s = _lstm_ref(sd_in, h_s, c_s, params['sent_decoder'])
        xd = jnp.transpose(emb[word_dec_inputs_list[i]], (1, 0, 2))
        ys, h_w, _ = _lstm_ref(xd, h_s, c_s, params['word_decoder'])
        sd_in = h_w[None]
        logits = jnp.einsum('tbh,hv->tbv', ys, params['fc_w']) + params['fc_b']
        outs.append(jnp.transpose(jax.nn.log_softmax(logits, axis=-1), (1, 0, 2)))
    return outs


# ----------------------------------------------------------------------------------
if __name__ == "__main__":
    vocab_size, embed_size, hidden_size = 64, 32, 32
    b_size = 2
    enc_lens_cfg = [5, 4, 6]
    dec_lens_cfg = [6, 5, 4]

    root = jax.random.PRNGKey(0)
    k_params, k_data = jax.random.split(root)
    params = init_params(k_params, vocab_size, embed_size, hidden_size)

    dkeys = jax.random.split(k_data, len(enc_lens_cfg) + len(dec_lens_cfg))
    word_encoder_inputs_list = [
        jax.random.randint(dkeys[i], (b_size, L), 0, vocab_size, jnp.int32)
        for i, L in enumerate(enc_lens_cfg)
    ]
    word_decoder_inputs_list = [
        jax.random.randint(dkeys[len(enc_lens_cfg) + i], (b_size, L), 0, vocab_size,
                           jnp.int32)
        for i, L in enumerate(dec_lens_cfg)
    ]

    # Pallas forward
    outs = hierarchical_forward(params, word_encoder_inputs_list,
                                word_decoder_inputs_list)
    outs = [jax.block_until_ready(o) for o in outs]

    # Pure-JAX f32 reference + check (kernels use bf16 MXU operands -> loose-ish tol)
    refs = hierarchical_forward_ref(params, word_encoder_inputs_list,
                                    word_decoder_inputs_list)
    refs = [jax.block_until_ready(r) for r in refs]

    assert len(outs) == len(word_decoder_inputs_list) - 1
    for o, r, L in zip(outs, refs, dec_lens_cfg[1:]):
        assert o.shape == (b_size, L, vocab_size), o.shape
        assert bool(jnp.allclose(o, r, atol=2e-2, rtol=2e-2)), "mismatch vs reference"

    print("KERNEL_OK")
</pallas_src>

<mosaic_0001>
module attributes {stable_mosaic.version = 11 : i64} {
  func.func @_lstm_kernel(%arg0: i32, %arg1: i32, %arg2: memref<6x8x32xbf16, #tpu.memory_space<vmem>>, %arg3: memref<8x32xf32, #tpu.memory_space<vmem>>, %arg4: memref<8x32xf32, #tpu.memory_space<vmem>>, %arg5: memref<8x1xi32, #tpu.memory_space<vmem>>, %arg6: memref<32x128xbf16, #tpu.memory_space<vmem>>, %arg7: memref<4x32x32xbf16, #tpu.memory_space<vmem>>, %arg8: memref<1x128xf32, #tpu.memory_space<vmem>>, %arg9: memref<6x8x32xf32, #tpu.memory_space<vmem>>, %arg10: memref<8x32xf32, #tpu.memory_space<vmem>>, %arg11: memref<8x32xf32, #tpu.memory_space<vmem>>, %arg12: memref<8x32xf32, #tpu.memory_space<vmem>>, %arg13: memref<8x32xf32, #tpu.memory_space<vmem>>, %arg14: memref<6x8x32xf32, #tpu.memory_space<vmem>>, %arg15: memref<6x8x32xf32, #tpu.memory_space<vmem>>, %arg16: memref<6x8x32xf32, #tpu.memory_space<vmem>>, %arg17: memref<6x8x32xf32, #tpu.memory_space<vmem>>) attributes {dimension_semantics = [#tpu.dimension_semantics<parallel>, #tpu.dimension_semantics<arbitrary>], iteration_bounds = array<i64: 1, 1>, scalar_prefetch = 0 : i64, scratch_operands = 6 : i64, tpu.core_type = #tpu.core_type<tc>, window_params = [{transform_indices = @transform_0, window_bounds = array<i64: 6, 8, 32>}, {transform_indices = @transform_1, window_bounds = array<i64: 8, 32>}, {transform_indices = @transform_2, window_bounds = array<i64: 8, 32>}, {transform_indices = @transform_3, window_bounds = array<i64: 8, 1>}, {pipeline_mode = #tpu.pipeline_mode<synchronous>, transform_indices = @transform_4, window_bounds = array<i64: 32, 128>}, {pipeline_mode = #tpu.pipeline_mode<synchronous>, transform_indices = @transform_5, window_bounds = array<i64: 4, 32, 32>}, {pipeline_mode = #tpu.pipeline_mode<synchronous>, transform_indices = @transform_6, window_bounds = array<i64: 1, 128>}, {transform_indices = @transform_7, window_bounds = array<i64: 6, 8, 32>}, {transform_indices = @transform_8, window_bounds = array<i64: 8, 32>}, {transform_indices = @transform_9, window_bounds = array<i64: 8, 32>}]} {
    %c0_i32 = arith.constant 0 : i32
    %0 = arith.cmpi eq, %arg1, %c0_i32 : i32
    %1 = arith.extui %0 : i1 to i32
    %c0_i32_0 = arith.constant 0 : i32
    %2 = arith.cmpi ne, %1, %c0_i32_0 : i32
    scf.if %2 {
      %c0_180 = arith.constant 0 : index
      %c0_181 = arith.constant 0 : index
      %405 = vector.load %arg3[%c0_180, %c0_181] : memref<8x32xf32, #tpu.memory_space<vmem>>, vector<8x32xf32>
      %c0_182 = arith.constant 0 : index
      %c0_183 = arith.constant 0 : index
      %406 = vector.load %arg12[%c0_182, %c0_183] : memref<8x32xf32, #tpu.memory_space<vmem>>, vector<8x32xf32>
      tpu.vector_store %arg12[%c0_182, %c0_183], %405 {strides = array<i32>} : memref<8x32xf32, #tpu.memory_space<vmem>>, vector<8x32xf32>,
      %c0_184 = arith.constant 0 : index
      %c0_185 = arith.constant 0 : index
      %407 = vector.load %arg4[%c0_184, %c0_185] : memref<8x32xf32, #tpu.memory_space<vmem>>, vector<8x32xf32>
      %c0_186 = arith.constant 0 : index
      %c0_187 = arith.constant 0 : index
      %408 = vector.load %arg13[%c0_186, %c0_187] : memref<8x32xf32, #tpu.memory_space<vmem>>, vector<8x32xf32>
      tpu.vector_store %arg13[%c0_186, %c0_187], %407 {strides = array<i32>} : memref<8x32xf32, #tpu.memory_space<vmem>>, vector<8x32xf32>,
    } else {
    }
    %c0 = arith.constant 0 : index
    %c0_1 = arith.constant 0 : index
    %c0_2 = arith.constant 0 : index
    %3 = vector.load %arg2[%c0, %c0_1, %c0_2] : memref<6x8x32xbf16, #tpu.memory_space<vmem>>, vector<6x8x32xbf16>
    %4 = vector.shape_cast %3 : vector<6x8x32xbf16> to vector<48x32xbf16>
    %c0_3 = arith.constant 0 : index
    %c0_4 = arith.constant 0 : index
    %5 = vector.load %arg6[%c0_3, %c0_4] : memref<32x128xbf16, #tpu.memory_space<vmem>>, vector<32x128xbf16>
    %cst = arith.constant dense<0.000000e+00> : vector<48x128xf32>
    %6 = tpu.matmul %4, %5, %cst {dimension_numbers = #tpu.dot_dimension_numbers<[1], [0], [0], [1], [0, 0, 1, 1], [], []>} : vector<48x32xbf16>, vector<32x128xbf16>, vector<48x128xf32> -> vector<48x128xf32>
    %c0_5 = arith.constant 0 : index
    %c0_6 = arith.constant 0 : index
    %7 = vector.load %arg8[%c0_5, %c0_6] : memref<1x128xf32, #tpu.memory_space<vmem>>, vector<1x128xf32>
    %8 = vector.broadcast %7 : vector<1x128xf32> to vector<48x128xf32>
    %9 = arith.addf %6, %8 : vector<48x128xf32>
    %10 = vector.extract_strided_slice %9 {offsets = [0, 0], sizes = [48, 32], strides = [1, 1]} : vector<48x128xf32> to vector<48x32xf32>
    %11 = vector.shape_cast %10 : vector<48x32xf32> to vector<6x8x32xf32>
    %c0_7 = arith.constant 0 : index
    %c0_8 = arith.constant 0 : index
    %c0_9 = arith.constant 0 : index
    %12 = vector.load %arg14[%c0_7, %c0_8, %c0_9] : memref<6x8x32xf32, #tpu.memory_space<vmem>>, vector<6x8x32xf32>
    tpu.vector_store %arg14[%c0_7, %c0_8, %c0_9], %11 {strides = array<i32>} : memref<6x8x32xf32, #tpu.memory_space<vmem>>, vector<6x8x32xf32>,
    %13 = vector.extract_strided_slice %9 {offsets = [0, 32], sizes = [48, 32], strides = [1, 1]} : vector<48x128xf32> to vector<48x32xf32>
    %14 = vector.shape_cast %13 : vector<48x32xf32> to vector<6x8x32xf32>
    %c0_10 = arith.constant 0 : index
    %c0_11 = arith.constant 0 : index
    %c0_12 = arith.constant 0 : index
    %15 = vector.load %arg15[%c0_10, %c0_11, %c0_12] : memref<6x8x32xf32, #tpu.memory_space<vmem>>, vector<6x8x32xf32>
    tpu.vector_store %arg15[%c0_10, %c0_11, %c0_12], %14 {strides = array<i32>} : memref<6x8x32xf32, #tpu.memory_space<vmem>>, vector<6x8x32xf32>,
    %16 = vector.extract_strided_slice %9 {offsets = [0, 64], sizes = [48, 32], strides = [1, 1]} : vector<48x128xf32> to vector<48x32xf32>
    %17 = vector.shape_cast %16 : vector<48x32xf32> to vector<6x8x32xf32>
    %c0_13 = arith.constant 0 : index
    %c0_14 = arith.constant 0 : index
    %c0_15 = arith.constant 0 : index
    %18 = vector.load %arg16[%c0_13, %c0_14, %c0_15] : memref<6x8x32xf32, #tpu.memory_space<vmem>>, vector<6x8x32xf32>
    tpu.vector_store %arg16[%c0_13, %c0_14, %c0_15], %17 {strides = array<i32>} : memref<6x8x32xf32, #tpu.memory_space<vmem>>, vector<6x8x32xf32>,
    %19 = vector.extract_strided_slice %9 {offsets = [0, 96], sizes = [48, 32], strides = [1, 1]} : vector<48x128xf32> to vector<48x32xf32>
    %20 = vector.shape_cast %19 : vector<48x32xf32> to vector<6x8x32xf32>
    %c0_16 = arith.constant 0 : index
    %c0_17 = arith.constant 0 : index
    %c0_18 = arith.constant 0 : index
    %21 = vector.load %arg17[%c0_16, %c0_17, %c0_18] : memref<6x8x32xf32, #tpu.memory_space<vmem>>, vector<6x8x32xf32>
    tpu.vector_store %arg17[%c0_16, %c0_17, %c0_18], %20 {strides = array<i32>} : memref<6x8x32xf32, #tpu.memory_space<vmem>>, vector<6x8x32xf32>,
    %c0_19 = arith.constant 0 : index
    %c0_20 = arith.constant 0 : index
    %c0_21 = arith.constant 0 : index
    %22 = vector.load %arg7[%c0_19, %c0_20, %c0_21] : memref<4x32x32xbf16, #tpu.memory_space<vmem>>, vector<1x32x32xbf16>
    %23 = vector.shape_cast %22 : vector<1x32x32xbf16> to vector<32x32xbf16>
    %c1 = arith.constant 1 : index
    %c0_22 = arith.constant 0 : index
    %c0_23 = arith.constant 0 : index
    %24 = vector.load %arg7[%c1, %c0_22, %c0_23] : memref<4x32x32xbf16, #tpu.memory_space<vmem>>, vector<1x32x32xbf16>
    %25 = vector.shape_cast %24 : vector<1x32x32xbf16> to vector<32x32xbf16>
    %c2 = arith.constant 2 : index
    %c0_24 = arith.constant 0 : index
    %c0_25 = arith.constant 0 : index
    %26 = vector.load %arg7[%c2, %c0_24, %c0_25] : memref<4x32x32xbf16, #tpu.memory_space<vmem>>, vector<1x32x32xbf16>
    %27 = vector.shape_cast %26 : vector<1x32x32xbf16> to vector<32x32xbf16>
    %c3 = arith.constant 3 : index
    %c0_26 = arith.constant 0 : index
    %c0_27 = arith.constant 0 : index
    %28 = vector.load %arg7[%c3, %c0_26, %c0_27] : memref<4x32x32xbf16, #tpu.memory_space<vmem>>, vector<1x32x32xbf16>
    %29 = vector.shape_cast %28 : vector<1x32x32xbf16> to vector<32x32xbf16>
    %c0_28 = arith.constant 0 : index
    %c0_29 = arith.constant 0 : index
    %30 = vector.load %arg5[%c0_28, %c0_29] : memref<8x1xi32, #tpu.memory_space<vmem>>, vector<8x1xi32>
    %c6_i32 = arith.constant 6 : i32
    %31 = arith.muli %arg1, %c6_i32 : i32
    %c0_30 = arith.constant 0 : index
    %c0_31 = arith.constant 0 : index
    %32 = vector.load %arg12[%c0_30, %c0_31] : memref<8x32xf32, #tpu.memory_space<vmem>>, vector<8x32xf32>
    %c0_32 = arith.constant 0 : index
    %c0_33 = arith.constant 0 : index
    %33 = vector.load %arg13[%c0_32, %c0_33] : memref<8x32xf32, #tpu.memory_space<vmem>>, vector<8x32xf32>
    %c0_i32_34 = arith.constant 0 : i32
    %34 = arith.index_cast %c0_i32_34 : i32 to index
    %c0_35 = arith.constant 0 : index
    %c0_36 = arith.constant 0 : index
    %35 = vector.load %arg14[%34, %c0_35, %c0_36] : memref<6x8x32xf32, #tpu.memory_space<vmem>>, vector<1x8x32xf32>
    %36 = vector.shape_cast %35 : vector<1x8x32xf32> to vector<8x32xf32>
    %37 = arith.index_cast %c0_i32_34 : i32 to index
    %c0_37 = arith.constant 0 : index
    %c0_38 = arith.constant 0 : index
    %38 = vector.load %arg15[%37, %c0_37, %c0_38] : memref<6x8x32xf32, #tpu.memory_space<vmem>>, vector<1x8x32xf32>
    %39 = vector.shape_cast %38 : vector<1x8x32xf32> to vector<8x32xf32>
    %40 = arith.index_cast %c0_i32_34 : i32 to index
    %c0_39 = arith.constant 0 : index
    %c0_40 = arith.constant 0 : index
    %41 = vector.load %arg16[%40, %c0_39, %c0_40] : memref<6x8x32xf32, #tpu.memory_space<vmem>>, vector<1x8x32xf32>
    %42 = vector.shape_cast %41 : vector<1x8x32xf32> to vector<8x32xf32>
    %43 = arith.index_cast %c0_i32_34 : i32 to index
    %c0_41 = arith.constant 0 : index
    %c0_42 = arith.constant 0 : index
    %44 = vector.load %arg17[%43, %c0_41, %c0_42] : memref<6x8x32xf32, #tpu.memory_space<vmem>>, vector<1x8x32xf32>
    %45 = vector.shape_cast %44 : vector<1x8x32xf32> to vector<8x32xf32>
    %46 = arith.truncf %32 : vector<8x32xf32> to vector<8x32xbf16>
    %cst_43 = arith.constant dense<0.000000e+00> : vector<8x32xf32>
    %47 = tpu.matmul %46, %23, %cst_43 {dimension_numbers = #tpu.dot_dimension_numbers<[1], [0], [0], [1], [0, 0, 1, 1], [], []>} : vector<8x32xbf16>, vector<32x32xbf16>, vector<8x32xf32> -> vector<8x32xf32>
    %48 = arith.addf %36, %47 : vector<8x32xf32>
    %cst_44 = arith.constant dense<0.000000e+00> : vector<8x32xf32>
    %49 = tpu.matmul %46, %25, %cst_44 {dimension_numbers = #tpu.dot_dimension_numbers<[1], [0], [0], [1], [0, 0, 1, 1], [], []>} : vector<8x32xbf16>, vector<32x32xbf16>, vector<8x32xf32> -> vector<8x32xf32>
    %50 = arith.addf %39, %49 : vector<8x32xf32>
    %cst_45 = arith.constant dense<0.000000e+00> : vector<8x32xf32>
    %51 = tpu.matmul %46, %27, %cst_45 {dimension_numbers = #tpu.dot_dimension_numbers<[1], [0], [0], [1], [0, 0, 1, 1], [], []>} : vector<8x32xbf16>, vector<32x32xbf16>, vector<8x32xf32> -> vector<8x32xf32>
    %52 = arith.addf %42, %51 : vector<8x32xf32>
    %cst_46 = arith.constant dense<0.000000e+00> : vector<8x32xf32>
    %53 = tpu.matmul %46, %29, %cst_46 {dimension_numbers = #tpu.dot_dimension_numbers<[1], [0], [0], [1], [0, 0, 1, 1], [], []>} : vector<8x32xbf16>, vector<32x32xbf16>, vector<8x32xf32> -> vector<8x32xf32>
    %54 = arith.addf %45, %53 : vector<8x32xf32>
    %cst_47 = arith.constant 5.000000e-01 : f32
    %55 = vector.broadcast %cst_47 : f32 to vector<8x32xf32>
    %56 = arith.mulf %55, %48 : vector<8x32xf32>
    %57 = math.tanh %56 : vector<8x32xf32>
    %cst_48 = arith.constant 5.000000e-01 : f32
    %58 = vector.broadcast %cst_48 : f32 to vector<8x32xf32>
    %59 = arith.mulf %58, %57 : vector<8x32xf32>
    %cst_49 = arith.constant 5.000000e-01 : f32
    %60 = vector.broadcast %cst_49 : f32 to vector<8x32xf32>
    %61 = arith.addf %59, %60 : vector<8x32xf32>
    %cst_50 = arith.constant 5.000000e-01 : f32
    %62 = vector.broadcast %cst_50 : f32 to vector<8x32xf32>
    %63 = arith.mulf %62, %50 : vector<8x32xf32>
    %64 = math.tanh %63 : vector<8x32xf32>
    %cst_51 = arith.constant 5.000000e-01 : f32
    %65 = vector.broadcast %cst_51 : f32 to vector<8x32xf32>
    %66 = arith.mulf %65, %64 : vector<8x32xf32>
    %cst_52 = arith.constant 5.000000e-01 : f32
    %67 = vector.broadcast %cst_52 : f32 to vector<8x32xf32>
    %68 = arith.addf %66, %67 : vector<8x32xf32>
    %69 = math.tanh %52 : vector<8x32xf32>
    %cst_53 = arith.constant 5.000000e-01 : f32
    %70 = vector.broadcast %cst_53 : f32 to vector<8x32xf32>
    %71 = arith.mulf %70, %54 : vector<8x32xf32>
    %72 = math.tanh %71 : vector<8x32xf32>
    %cst_54 = arith.constant 5.000000e-01 : f32
    %73 = vector.broadcast %cst_54 : f32 to vector<8x32xf32>
    %74 = arith.mulf %73, %72 : vector<8x32xf32>
    %cst_55 = arith.constant 5.000000e-01 : f32
    %75 = vector.broadcast %cst_55 : f32 to vector<8x32xf32>
    %76 = arith.addf %74, %75 : vector<8x32xf32>
    %77 = arith.mulf %68, %33 : vector<8x32xf32>
    %78 = arith.mulf %61, %69 : vector<8x32xf32>
    %79 = arith.addf %77, %78 : vector<8x32xf32>
    %80 = math.tanh %79 : vector<8x32xf32>
    %81 = arith.mulf %76, %80 : vector<8x32xf32>
    %82 = arith.addi %31, %c0_i32_34 : i32
    %83 = vector.broadcast %82 : i32 to vector<8x1xi32>
    %84 = arith.cmpi slt, %83, %30 : vector<8x1xi32>
    %85 = vector.shape_cast %84 : vector<8x1xi1> to vector<8x1xi1>
    %86 = vector.broadcast %85 : vector<8x1xi1> to vector<8x32xi1>
    %87 = arith.select %86, %81, %32 : vector<8x32xi1>, vector<8x32xf32>
    %88 = vector.shape_cast %84 : vector<8x1xi1> to vector<8x1xi1>
    %89 = vector.broadcast %88 : vector<8x1xi1> to vector<8x32xi1>
    %90 = arith.select %89, %79, %33 : vector<8x32xi1>, vector<8x32xf32>
    %91 = arith.index_cast %c0_i32_34 : i32 to index
    %c0_56 = arith.constant 0 : index
    %c0_57 = arith.constant 0 : index
    %92 = vector.load %arg9[%91, %c0_56, %c0_57] : memref<6x8x32xf32, #tpu.memory_space<vmem>>, vector<1x8x32xf32>
    %93 = vector.shape_cast %92 : vector<1x8x32xf32> to vector<8x32xf32>
    %94 = vector.shape_cast %87 : vector<8x32xf32> to vector<1x8x32xf32>
    tpu.vector_store %arg9[%91, %c0_56, %c0_57], %94 {strides = array<i32>} : memref<6x8x32xf32, #tpu.memory_space<vmem>>, vector<1x8x32xf32>,
    %c1_i32 = arith.constant 1 : i32
    %95 = arith.index_cast %c1_i32 : i32 to index
    %c0_58 = arith.constant 0 : index
    %c0_59 = arith.constant 0 : index
    %96 = vector.load %arg14[%95, %c0_58, %c0_59] : memref<6x8x32xf32, #tpu.memory_space<vmem>>, vector<1x8x32xf32>
    %97 = vector.shape_cast %96 : vector<1x8x32xf32> to vector<8x32xf32>
    %98 = arith.index_cast %c1_i32 : i32 to index
    %c0_60 = arith.constant 0 : index
    %c0_61 = arith.constant 0 : index
    %99 = vector.load %arg15[%98, %c0_60, %c0_61] : memref<6x8x32xf32, #tpu.memory_space<vmem>>, vector<1x8x32xf32>
    %100 = vector.shape_cast %99 : vector<1x8x32xf32> to vector<8x32xf32>
    %101 = arith.index_cast %c1_i32 : i32 to index
    %c0_62 = arith.constant 0 : index
    %c0_63 = arith.constant 0 : index
    %102 = vector.load %arg16[%101, %c0_62, %c0_63] : memref<6x8x32xf32, #tpu.memory_space<vmem>>, vector<1x8x32xf32>
    %103 = vector.shape_cast %102 : vector<1x8x32xf32> to vector<8x32xf32>
    %104 = arith.index_cast %c1_i32 : i32 to index
    %c0_64 = arith.constant 0 : index
    %c0_65 = arith.constant 0 : index
    %105 = vector.load %arg17[%104, %c0_64, %c0_65] : memref<6x8x32xf32, #tpu.memory_space<vmem>>, vector<1x8x32xf32>
    %106 = vector.shape_cast %105 : vector<1x8x32xf32> to vector<8x32xf32>
    %107 = arith.truncf %87 : vector<8x32xf32> to vector<8x32xbf16>
    %cst_66 = arith.constant dense<0.000000e+00> : vector<8x32xf32>
    %108 = tpu.matmul %107, %23, %cst_66 {dimension_numbers = #tpu.dot_dimension_numbers<[1], [0], [0], [1], [0, 0, 1, 1], [], []>} : vector<8x32xbf16>, vector<32x32xbf16>, vector<8x32xf32> -> vector<8x32xf32>
    %109 = arith.addf %97, %108 : vector<8x32xf32>
    %cst_67 = arith.constant dense<0.000000e+00> : vector<8x32xf32>
    %110 = tpu.matmul %107, %25, %cst_67 {dimension_numbers = #tpu.dot_dimension_numbers<[1], [0], [0], [1], [0, 0, 1, 1], [], []>} : vector<8x32xbf16>, vector<32x32xbf16>, vector<8x32xf32> -> vector<8x32xf32>
    %111 = arith.addf %100, %110 : vector<8x32xf32>
    %cst_68 = arith.constant dense<0.000000e+00> : vector<8x32xf32>
    %112 = tpu.matmul %107, %27, %cst_68 {dimension_numbers = #tpu.dot_dimension_numbers<[1], [0], [0], [1], [0, 0, 1, 1], [], []>} : vector<8x32xbf16>, vector<32x32xbf16>, vector<8x32xf32> -> vector<8x32xf32>
    %113 = arith.addf %103, %112 : vector<8x32xf32>
    %cst_69 = arith.constant dense<0.000000e+00> : vector<8x32xf32>
    %114 = tpu.matmul %107, %29, %cst_69 {dimension_numbers = #tpu.dot_dimension_numbers<[1], [0], [0], [1], [0, 0, 1, 1], [], []>} : vector<8x32xbf16>, vector<32x32xbf16>, vector<8x32xf32> -> vector<8x32xf32>
    %115 = arith.addf %106, %114 : vector<8x32xf32>
    %cst_70 = arith.constant 5.000000e-01 : f32
    %116 = vector.broadcast %cst_70 : f32 to vector<8x32xf32>
    %117 = arith.mulf %116, %109 : vector<8x32xf32>
    %118 = math.tanh %117 : vector<8x32xf32>
    %cst_71 = arith.constant 5.000000e-01 : f32
    %119 = vector.broadcast %cst_71 : f32 to vector<8x32xf32>
    %120 = arith.mulf %119, %118 : vector<8x32xf32>
    %cst_72 = arith.constant 5.000000e-01 : f32
    %121 = vector.broadcast %cst_72 : f32 to vector<8x32xf32>
    %122 = arith.addf %120, %121 : vector<8x32xf32>
    %cst_73 = arith.constant 5.000000e-01 : f32
    %123 = vector.broadcast %cst_73 : f32 to vector<8x32xf32>
    %124 = arith.mulf %123, %111 : vector<8x32xf32>
    %125 = math.tanh %124 : vector<8x32xf32>
    %cst_74 = arith.constant 5.000000e-01 : f32
    %126 = vector.broadcast %cst_74 : f32 to vector<8x32xf32>
    %127 = arith.mulf %126, %125 : vector<8x32xf32>
    %cst_75 = arith.constant 5.000000e-01 : f32
    %128 = vector.broadcast %cst_75 : f32 to vector<8x32xf32>
    %129 = arith.addf %127, %128 : vector<8x32xf32>
    %130 = math.tanh %113 : vector<8x32xf32>
    %cst_76 = arith.constant 5.000000e-01 : f32
    %131 = vector.broadcast %cst_76 : f32 to vector<8x32xf32>
    %132 = arith.mulf %131, %115 : vector<8x32xf32>
    %133 = math.tanh %132 : vector<8x32xf32>
    %cst_77 = arith.constant 5.000000e-01 : f32
    %134 = vector.broadcast %cst_77 : f32 to vector<8x32xf32>
    %135 = arith.mulf %134, %133 : vector<8x32xf32>
    %cst_78 = arith.constant 5.000000e-01 : f32
    %136 = vector.broadcast %cst_78 : f32 to vector<8x32xf32>
    %137 = arith.addf %135, %136 : vector<8x32xf32>
    %138 = arith.mulf %129, %90 : vector<8x32xf32>
    %139 = arith.mulf %122, %130 : vector<8x32xf32>
    %140 = arith.addf %138, %139 : vector<8x32xf32>
    %141 = math.tanh %140 : vector<8x32xf32>
    %142 = arith.mulf %137, %141 : vector<8x32xf32>
    %143 = arith.addi %31, %c1_i32 : i32
    %144 = vector.broadcast %143 : i32 to vector<8x1xi32>
    %145 = arith.cmpi slt, %144, %30 : vector<8x1xi32>
    %146 = vector.shape_cast %145 : vector<8x1xi1> to vector<8x1xi1>
    %147 = vector.broadcast %146 : vector<8x1xi1> to vector<8x32xi1>
    %148 = arith.select %147, %142, %87 : vector<8x32xi1>, vector<8x32xf32>
    %149 = vector.shape_cast %145 : vector<8x1xi1> to vector<8x1xi1>
    %150 = vector.broadcast %149 : vector<8x1xi1> to vector<8x32xi1>
    %151 = arith.select %150, %140, %90 : vector<8x32xi1>, vector<8x32xf32>
    %152 = arith.index_cast %c1_i32 : i32 to index
    %c0_79 = arith.constant 0 : index
    %c0_80 = arith.constant 0 : index
    %153 = vector.load %arg9[%152, %c0_79, %c0_80] : memref<6x8x32xf32, #tpu.memory_space<vmem>>, vector<1x8x32xf32>
    %154 = vector.shape_cast %153 : vector<1x8x32xf32> to vector<8x32xf32>
    %155 = vector.shape_cast %148 : vector<8x32xf32> to vector<1x8x32xf32>
    tpu.vector_store %arg9[%152, %c0_79, %c0_80], %155 {strides = array<i32>} : memref<6x8x32xf32, #tpu.memory_space<vmem>>, vector<1x8x32xf32>,
    %c2_i32 = arith.constant 2 : i32
    %156 = arith.index_cast %c2_i32 : i32 to index
    %c0_81 = arith.constant 0 : index
    %c0_82 = arith.constant 0 : index
    %157 = vector.load %arg14[%156, %c0_81, %c0_82] : memref<6x8x32xf32, #tpu.memory_space<vmem>>, vector<1x8x32xf32>
    %158 = vector.shape_cast %157 : vector<1x8x32xf32> to vector<8x32xf32>
    %159 = arith.index_cast %c2_i32 : i32 to index
    %c0_83 = arith.constant 0 : index
    %c0_84 = arith.constant 0 : index
    %160 = vector.load %arg15[%159, %c0_83, %c0_84] : memref<6x8x32xf32, #tpu.memory_space<vmem>>, vector<1x8x32xf32>
    %161 = vector.shape_cast %160 : vector<1x8x32xf32> to vector<8x32xf32>
    %162 = arith.index_cast %c2_i32 : i32 to index
    %c0_85 = arith.constant 0 : index
    %c0_86 = arith.constant 0 : index
    %163 = vector.load %arg16[%162, %c0_85, %c0_86] : memref<6x8x32xf32, #tpu.memory_space<vmem>>, vector<1x8x32xf32>
    %164 = vector.shape_cast %163 : vector<1x8x32xf32> to vector<8x32xf32>
    %165 = arith.index_cast %c2_i32 : i32 to index
    %c0_87 = arith.constant 0 : index
    %c0_88 = arith.constant 0 : index
    %166 = vector.load %arg17[%165, %c0_87, %c0_88] : memref<6x8x32xf32, #tpu.memory_space<vmem>>, vector<1x8x32xf32>
    %167 = vector.shape_cast %166 : vector<1x8x32xf32> to vector<8x32xf32>
    %168 = arith.truncf %148 : vector<8x32xf32> to vector<8x32xbf16>
    %cst_89 = arith.constant dense<0.000000e+00> : vector<8x32xf32>
    %169 = tpu.matmul %168, %23, %cst_89 {dimension_numbers = #tpu.dot_dimension_numbers<[1], [0], [0], [1], [0, 0, 1, 1], [], []>} : vector<8x32xbf16>, vector<32x32xbf16>, vector<8x32xf32> -> vector<8x32xf32>
    %170 = arith.addf %158, %169 : vector<8x32xf32>
    %cst_90 = arith.constant dense<0.000000e+00> : vector<8x32xf32>
    %171 = tpu.matmul %168, %25, %cst_90 {dimension_numbers = #tpu.dot_dimension_numbers<[1], [0], [0], [1], [0, 0, 1, 1], [], []>} : vector<8x32xbf16>, vector<32x32xbf16>, vector<8x32xf32> -> vector<8x32xf32>
    %172 = arith.addf %161, %171 : vector<8x32xf32>
    %cst_91 = arith.constant dense<0.000000e+00> : vector<8x32xf32>
    %173 = tpu.matmul %168, %27, %cst_91 {dimension_numbers = #tpu.dot_dimension_numbers<[1], [0], [0], [1], [0, 0, 1, 1], [], []>} : vector<8x32xbf16>, vector<32x32xbf16>, vector<8x32xf32> -> vector<8x32xf32>
    %174 = arith.addf %164, %173 : vector<8x32xf32>
    %cst_92 = arith.constant dense<0.000000e+00> : vector<8x32xf32>
    %175 = tpu.matmul %168, %29, %cst_92 {dimension_numbers = #tpu.dot_dimension_numbers<[1], [0], [0], [1], [0, 0, 1, 1], [], []>} : vector<8x32xbf16>, vector<32x32xbf16>, vector<8x32xf32> -> vector<8x32xf32>
    %176 = arith.addf %167, %175 : vector<8x32xf32>
    %cst_93 = arith.constant 5.000000e-01 : f32
    %177 = vector.broadcast %cst_93 : f32 to vector<8x32xf32>
    %178 = arith.mulf %177, %170 : vector<8x32xf32>
    %179 = math.tanh %178 : vector<8x32xf32>
    %cst_94 = arith.constant 5.000000e-01 : f32
    %180 = vector.broadcast %cst_94 : f32 to vector<8x32xf32>
    %181 = arith.mulf %180, %179 : vector<8x32xf32>
    %cst_95 = arith.constant 5.000000e-01 : f32
    %182 = vector.broadcast %cst_95 : f32 to vector<8x32xf32>
    %183 = arith.addf %181, %182 : vector<8x32xf32>
    %cst_96 = arith.constant 5.000000e-01 : f32
    %184 = vector.broadcast %cst_96 : f32 to vector<8x32xf32>
    %185 = arith.mulf %184, %172 : vector<8x32xf32>
    %186 = math.tanh %185 : vector<8x32xf32>
    %cst_97 = arith.constant 5.000000e-01 : f32
    %187 = vector.broadcast %cst_97 : f32 to vector<8x32xf32>
    %188 = arith.mulf %187, %186 : vector<8x32xf32>
    %cst_98 = arith.constant 5.000000e-01 : f32
    %189 = vector.broadcast %cst_98 : f32 to vector<8x32xf32>
    %190 = arith.addf %188, %189 : vector<8x32xf32>
    %191 = math.tanh %174 : vector<8x32xf32>
    %cst_99 = arith.constant 5.000000e-01 : f32
    %192 = vector.broadcast %cst_99 : f32 to vector<8x32xf32>
    %193 = arith.mulf %192, %176 : vector<8x32xf32>
    %194 = math.tanh %193 : vector<8x32xf32>
    %cst_100 = arith.constant 5.000000e-01 : f32
    %195 = vector.broadcast %cst_100 : f32 to vector<8x32xf32>
    %196 = arith.mulf %195, %194 : vector<8x32xf32>
    %cst_101 = arith.constant 5.000000e-01 : f32
    %197 = vector.broadcast %cst_101 : f32 to vector<8x32xf32>
    %198 = arith.addf %196, %197 : vector<8x32xf32>
    %199 = arith.mulf %190, %151 : vector<8x32xf32>
    %200 = arith.mulf %183, %191 : vector<8x32xf32>
    %201 = arith.addf %199, %200 : vector<8x32xf32>
    %202 = math.tanh %201 : vector<8x32xf32>
    %203 = arith.mulf %198, %202 : vector<8x32xf32>
    %204 = arith.addi %31, %c2_i32 : i32
    %205 = vector.broadcast %204 : i32 to vector<8x1xi32>
    %206 = arith.cmpi slt, %205, %30 : vector<8x1xi32>
    %207 = vector.shape_cast %206 : vector<8x1xi1> to vector<8x1xi1>
    %208 = vector.broadcast %207 : vector<8x1xi1> to vector<8x32xi1>
    %209 = arith.select %208, %203, %148 : vector<8x32xi1>, vector<8x32xf32>
    %210 = vector.shape_cast %206 : vector<8x1xi1> to vector<8x1xi1>
    %211 = vector.broadcast %210 : vector<8x1xi1> to vector<8x32xi1>
    %212 = arith.select %211, %201, %151 : vector<8x32xi1>, vector<8x32xf32>
    %213 = arith.index_cast %c2_i32 : i32 to index
    %c0_102 = arith.constant 0 : index
    %c0_103 = arith.constant 0 : index
    %214 = vector.load %arg9[%213, %c0_102, %c0_103] : memref<6x8x32xf32, #tpu.memory_space<vmem>>, vector<1x8x32xf32>
    %215 = vector.shape_cast %214 : vector<1x8x32xf32> to vector<8x32xf32>
    %216 = vector.shape_cast %209 : vector<8x32xf32> to vector<1x8x32xf32>
    tpu.vector_store %arg9[%213, %c0_102, %c0_103], %216 {strides = array<i32>} : memref<6x8x32xf32, #tpu.memory_space<vmem>>, vector<1x8x32xf32>,
    %c3_i32 = arith.constant 3 : i32
    %217 = arith.index_cast %c3_i32 : i32 to index
    %c0_104 = arith.constant 0 : index
    %c0_105 = arith.constant 0 : index
    %218 = vector.load %arg14[%217, %c0_104, %c0_105] : memref<6x8x32xf32, #tpu.memory_space<vmem>>, vector<1x8x32xf32>
    %219 = vector.shape_cast %218 : vector<1x8x32xf32> to vector<8x32xf32>
    %220 = arith.index_cast %c3_i32 : i32 to index
    %c0_106 = arith.constant 0 : index
    %c0_107 = arith.constant 0 : index
    %221 = vector.load %arg15[%220, %c0_106, %c0_107] : memref<6x8x32xf32, #tpu.memory_space<vmem>>, vector<1x8x32xf32>
    %222 = vector.shape_cast %221 : vector<1x8x32xf32> to vector<8x32xf32>
    %223 = arith.index_cast %c3_i32 : i32 to index
    %c0_108 = arith.constant 0 : index
    %c0_109 = arith.constant 0 : index
    %224 = vector.load %arg16[%223, %c0_108, %c0_109] : memref<6x8x32xf32, #tpu.memory_space<vmem>>, vector<1x8x32xf32>
    %225 = vector.shape_cast %224 : vector<1x8x32xf32> to vector<8x32xf32>
    %226 = arith.index_cast %c3_i32 : i32 to index
    %c0_110 = arith.constant 0 : index
    %c0_111 = arith.constant 0 : index
    %227 = vector.load %arg17[%226, %c0_110, %c0_111] : memref<6x8x32xf32, #tpu.memory_space<vmem>>, vector<1x8x32xf32>
    %228 = vector.shape_cast %227 : vector<1x8x32xf32> to vector<8x32xf32>
    %229 = arith.truncf %209 : vector<8x32xf32> to vector<8x32xbf16>
    %cst_112 = arith.constant dense<0.000000e+00> : vector<8x32xf32>
    %230 = tpu.matmul %229, %23, %cst_112 {dimension_numbers = #tpu.dot_dimension_numbers<[1], [0], [0], [1], [0, 0, 1, 1], [], []>} : vector<8x32xbf16>, vector<32x32xbf16>, vector<8x32xf32> -> vector<8x32xf32>
    %231 = arith.addf %219, %230 : vector<8x32xf32>
    %cst_113 = arith.constant dense<0.000000e+00> : vector<8x32xf32>
    %232 = tpu.matmul %229, %25, %cst_113 {dimension_numbers = #tpu.dot_dimension_numbers<[1], [0], [0], [1], [0, 0, 1, 1], [], []>} : vector<8x32xbf16>, vector<32x32xbf16>, vector<8x32xf32> -> vector<8x32xf32>
    %233 = arith.addf %222, %232 : vector<8x32xf32>
    %cst_114 = arith.constant dense<0.000000e+00> : vector<8x32xf32>
    %234 = tpu.matmul %229, %27, %cst_114 {dimension_numbers = #tpu.dot_dimension_numbers<[1], [0], [0], [1], [0, 0, 1, 1], [], []>} : vector<8x32xbf16>, vector<32x32xbf16>, vector<8x32xf32> -> vector<8x32xf32>
    %235 = arith.addf %225, %234 : vector<8x32xf32>
    %cst_115 = arith.constant dense<0.000000e+00> : vector<8x32xf32>
    %236 = tpu.matmul %229, %29, %cst_115 {dimension_numbers = #tpu.dot_dimension_numbers<[1], [0], [0], [1], [0, 0, 1, 1], [], []>} : vector<8x32xbf16>, vector<32x32xbf16>, vector<8x32xf32> -> vector<8x32xf32>
    %237 = arith.addf %228, %236 : vector<8x32xf32>
    %cst_116 = arith.constant 5.000000e-01 : f32
    %238 = vector.broadcast %cst_116 : f32 to vector<8x32xf32>
    %239 = arith.mulf %238, %231 : vector<8x32xf32>
    %240 = math.tanh %239 : vector<8x32xf32>
    %cst_117 = arith.constant 5.000000e-01 : f32
    %241 = vector.broadcast %cst_117 : f32 to vector<8x32xf32>
    %242 = arith.mulf %241, %240 : vector<8x32xf32>
    %cst_118 = arith.constant 5.000000e-01 : f32
    %243 = vector.broadcast %cst_118 : f32 to vector<8x32xf32>
    %244 = arith.addf %242, %243 : vector<8x32xf32>
    %cst_119 = arith.constant 5.000000e-01 : f32
    %245 = vector.broadcast %cst_119 : f32 to vector<8x32xf32>
    %246 = arith.mulf %245, %233 : vector<8x32xf32>
    %247 = math.tanh %246 : vector<8x32xf32>
    %cst_120 = arith.constant 5.000000e-01 : f32
    %248 = vector.broadcast %cst_120 : f32 to vector<8x32xf32>
    %249 = arith.mulf %248, %247 : vector<8x32xf32>
    %cst_121 = arith.constant 5.000000e-01 : f32
    %250 = vector.broadcast %cst_121 : f32 to vector<8x32xf32>
    %251 = arith.addf %249, %250 : vector<8x32xf32>
    %252 = math.tanh %235 : vector<8x32xf32>
    %cst_122 = arith.constant 5.000000e-01 : f32
    %253 = vector.broadcast %cst_122 : f32 to vector<8x32xf32>
    %254 = arith.mulf %253, %237 : vector<8x32xf32>
    %255 = math.tanh %254 : vector<8x32xf32>
    %cst_123 = arith.constant 5.000000e-01 : f32
    %256 = vector.broadcast %cst_123 : f32 to vector<8x32xf32>
    %257 = arith.mulf %256, %255 : vector<8x32xf32>
    %cst_124 = arith.constant 5.000000e-01 : f32
    %258 = vector.broadcast %cst_124 : f32 to vector<8x32xf32>
    %259 = arith.addf %257, %258 : vector<8x32xf32>
    %260 = arith.mulf %251, %212 : vector<8x32xf32>
    %261 = arith.mulf %244, %252 : vector<8x32xf32>
    %262 = arith.addf %260, %261 : vector<8x32xf32>
    %263 = math.tanh %262 : vector<8x32xf32>
    %264 = arith.mulf %259, %263 : vector<8x32xf32>
    %265 = arith.addi %31, %c3_i32 : i32
    %266 = vector.broadcast %265 : i32 to vector<8x1xi32>
    %267 = arith.cmpi slt, %266, %30 : vector<8x1xi32>
    %268 = vector.shape_cast %267 : vector<8x1xi1> to vector<8x1xi1>
    %269 = vector.broadcast %268 : vector<8x1xi1> to vector<8x32xi1>
    %270 = arith.select %269, %264, %209 : vector<8x32xi1>, vector<8x32xf32>
    %271 = vector.shape_cast %267 : vector<8x1xi1> to vector<8x1xi1>
    %272 = vector.broadcast %271 : vector<8x1xi1> to vector<8x32xi1>
    %273 = arith.select %272, %262, %212 : vector<8x32xi1>, vector<8x32xf32>
    %274 = arith.index_cast %c3_i32 : i32 to index
    %c0_125 = arith.constant 0 : index
    %c0_126 = arith.constant 0 : index
    %275 = vector.load %arg9[%274, %c0_125, %c0_126] : memref<6x8x32xf32, #tpu.memory_space<vmem>>, vector<1x8x32xf32>
    %276 = vector.shape_cast %275 : vector<1x8x32xf32> to vector<8x32xf32>
    %277 = vector.shape_cast %270 : vector<8x32xf32> to vector<1x8x32xf32>
    tpu.vector_store %arg9[%274, %c0_125, %c0_126], %277 {strides = array<i32>} : memref<6x8x32xf32, #tpu.memory_space<vmem>>, vector<1x8x32xf32>,
    %c4_i32 = arith.constant 4 : i32
    %278 = arith.index_cast %c4_i32 : i32 to index
    %c0_127 = arith.constant 0 : index
    %c0_128 = arith.constant 0 : index
    %279 = vector.load %arg14[%278, %c0_127, %c0_128] : memref<6x8x32xf32, #tpu.memory_space<vmem>>, vector<1x8x32xf32>
    %280 = vector.shape_cast %279 : vector<1x8x32xf32> to vector<8x32xf32>
    %281 = arith.index_cast %c4_i32 : i32 to index
    %c0_129 = arith.constant 0 : index
    %c0_130 = arith.constant 0 : index
    %282 = vector.load %arg15[%281, %c0_129, %c0_130] : memref<6x8x32xf32, #tpu.memory_space<vmem>>, vector<1x8x32xf32>
    %283 = vector.shape_cast %282 : vector<1x8x32xf32> to vector<8x32xf32>
    %284 = arith.index_cast %c4_i32 : i32 to index
    %c0_131 = arith.constant 0 : index
    %c0_132 = arith.constant 0 : index
    %285 = vector.load %arg16[%284, %c0_131, %c0_132] : memref<6x8x32xf32, #tpu.memory_space<vmem>>, vector<1x8x32xf32>
    %286 = vector.shape_cast %285 : vector<1x8x32xf32> to vector<8x32xf32>
    %287 = arith.index_cast %c4_i32 : i32 to index
    %c0_133 = arith.constant 0 : index
    %c0_134 = arith.constant 0 : index
    %288 = vector.load %arg17[%287, %c0_133, %c0_134] : memref<6x8x32xf32, #tpu.memory_space<vmem>>, vector<1x8x32xf32>
    %289 = vector.shape_cast %288 : vector<1x8x32xf32> to vector<8x32xf32>
    %290 = arith.truncf %270 : vector<8x32xf32> to vector<8x32xbf16>
    %cst_135 = arith.constant dense<0.000000e+00> : vector<8x32xf32>
    %291 = tpu.matmul %290, %23, %cst_135 {dimension_numbers = #tpu.dot_dimension_numbers<[1], [0], [0], [1], [0, 0, 1, 1], [], []>} : vector<8x32xbf16>, vector<32x32xbf16>, vector<8x32xf32> -> vector<8x32xf32>
    %292 = arith.addf %280, %291 : vector<8x32xf32>
    %cst_136 = arith.constant dense<0.000000e+00> : vector<8x32xf32>
    %293 = tpu.matmul %290, %25, %cst_136 {dimension_numbers = #tpu.dot_dimension_numbers<[1], [0], [0], [1], [0, 0, 1, 1], [], []>} : vector<8x32xbf16>, vector<32x32xbf16>, vector<8x32xf32> -> vector<8x32xf32>
    %294 = arith.addf %283, %293 : vector<8x32xf32>
    %cst_137 = arith.constant dense<0.000000e+00> : vector<8x32xf32>
    %295 = tpu.matmul %290, %27, %cst_137 {dimension_numbers = #tpu.dot_dimension_numbers<[1], [0], [0], [1], [0, 0, 1, 1], [], []>} : vector<8x32xbf16>, vector<32x32xbf16>, vector<8x32xf32> -> vector<8x32xf32>
    %296 = arith.addf %286, %295 : vector<8x32xf32>
    %cst_138 = arith.constant dense<0.000000e+00> : vector<8x32xf32>
    %297 = tpu.matmul %290, %29, %cst_138 {dimension_numbers = #tpu.dot_dimension_numbers<[1], [0], [0], [1], [0, 0, 1, 1], [], []>} : vector<8x32xbf16>, vector<32x32xbf16>, vector<8x32xf32> -> vector<8x32xf32>
    %298 = arith.addf %289, %297 : vector<8x32xf32>
    %cst_139 = arith.constant 5.000000e-01 : f32
    %299 = vector.broadcast %cst_139 : f32 to vector<8x32xf32>
    %300 = arith.mulf %299, %292 : vector<8x32xf32>
    %301 = math.tanh %300 : vector<8x32xf32>
    %cst_140 = arith.constant 5.000000e-01 : f32
    %302 = vector.broadcast %cst_140 : f32 to vector<8x32xf32>
    %303 = arith.mulf %302, %301 : vector<8x32xf32>
    %cst_141 = arith.constant 5.000000e-01 : f32
    %304 = vector.broadcast %cst_141 : f32 to vector<8x32xf32>
    %305 = arith.addf %303, %304 : vector<8x32xf32>
    %cst_142 = arith.constant 5.000000e-01 : f32
    %306 = vector.broadcast %cst_142 : f32 to vector<8x32xf32>
    %307 = arith.mulf %306, %294 : vector<8x32xf32>
    %308 = math.tanh %307 : vector<8x32xf32>
    %cst_143 = arith.constant 5.000000e-01 : f32
    %309 = vector.broadcast %cst_143 : f32 to vector<8x32xf32>
    %310 = arith.mulf %309, %308 : vector<8x32xf32>
    %cst_144 = arith.constant 5.000000e-01 : f32
    %311 = vector.broadcast %cst_144 : f32 to vector<8x32xf32>
    %312 = arith.addf %310, %311 : vector<8x32xf32>
    %313 = math.tanh %296 : vector<8x32xf32>
    %cst_145 = arith.constant 5.000000e-01 : f32
    %314 = vector.broadcast %cst_145 : f32 to vector<8x32xf32>
    %315 = arith.mulf %314, %298 : vector<8x32xf32>
    %316 = math.tanh %315 : vector<8x32xf32>
    %cst_146 = arith.constant 5.000000e-01 : f32
    %317 = vector.broadcast %cst_146 : f32 to vector<8x32xf32>
    %318 = arith.mulf %317, %316 : vector<8x32xf32>
    %cst_147 = arith.constant 5.000000e-01 : f32
    %319 = vector.broadcast %cst_147 : f32 to vector<8x32xf32>
    %320 = arith.addf %318, %319 : vector<8x32xf32>
    %321 = arith.mulf %312, %273 : vector<8x32xf32>
    %322 = arith.mulf %305, %313 : vector<8x32xf32>
    %323 = arith.addf %321, %322 : vector<8x32xf32>
    %324 = math.tanh %323 : vector<8x32xf32>
    %325 = arith.mulf %320, %324 : vector<8x32xf32>
    %326 = arith.addi %31, %c4_i32 : i32
    %327 = vector.broadcast %326 : i32 to vector<8x1xi32>
    %328 = arith.cmpi slt, %327, %30 : vector<8x1xi32>
    %329 = vector.shape_cast %328 : vector<8x1xi1> to vector<8x1xi1>
    %330 = vector.broadcast %329 : vector<8x1xi1> to vector<8x32xi1>
    %331 = arith.select %330, %325, %270 : vector<8x32xi1>, vector<8x32xf32>
    %332 = vector.shape_cast %328 : vector<8x1xi1> to vector<8x1xi1>
    %333 = vector.broadcast %332 : vector<8x1xi1> to vector<8x32xi1>
    %334 = arith.select %333, %323, %273 : vector<8x32xi1>, vector<8x32xf32>
    %335 = arith.index_cast %c4_i32 : i32 to index
    %c0_148 = arith.constant 0 : index
    %c0_149 = arith.constant 0 : index
    %336 = vector.load %arg9[%335, %c0_148, %c0_149] : memref<6x8x32xf32, #tpu.memory_space<vmem>>, vector<1x8x32xf32>
    %337 = vector.shape_cast %336 : vector<1x8x32xf32> to vector<8x32xf32>
    %338 = vector.shape_cast %331 : vector<8x32xf32> to vector<1x8x32xf32>
    tpu.vector_store %arg9[%335, %c0_148, %c0_149], %338 {strides = array<i32>} : memref<6x8x32xf32, #tpu.memory_space<vmem>>, vector<1x8x32xf32>,
    %c5_i32 = arith.constant 5 : i32
    %339 = arith.index_cast %c5_i32 : i32 to index
    %c0_150 = arith.constant 0 : index
    %c0_151 = arith.constant 0 : index
    %340 = vector.load %arg14[%339, %c0_150, %c0_151] : memref<6x8x32xf32, #tpu.memory_space<vmem>>, vector<1x8x32xf32>
    %341 = vector.shape_cast %340 : vector<1x8x32xf32> to vector<8x32xf32>
    %342 = arith.index_cast %c5_i32 : i32 to index
    %c0_152 = arith.constant 0 : index
    %c0_153 = arith.constant 0 : index
    %343 = vector.load %arg15[%342, %c0_152, %c0_153] : memref<6x8x32xf32, #tpu.memory_space<vmem>>, vector<1x8x32xf32>
    %344 = vector.shape_cast %343 : vector<1x8x32xf32> to vector<8x32xf32>
    %345 = arith.index_cast %c5_i32 : i32 to index
    %c0_154 = arith.constant 0 : index
    %c0_155 = arith.constant 0 : index
    %346 = vector.load %arg16[%345, %c0_154, %c0_155] : memref<6x8x32xf32, #tpu.memory_space<vmem>>, vector<1x8x32xf32>
    %347 = vector.shape_cast %346 : vector<1x8x32xf32> to vector<8x32xf32>
    %348 = arith.index_cast %c5_i32 : i32 to index
    %c0_156 = arith.constant 0 : index
    %c0_157 = arith.constant 0 : index
    %349 = vector.load %arg17[%348, %c0_156, %c0_157] : memref<6x8x32xf32, #tpu.memory_space<vmem>>, vector<1x8x32xf32>
    %350 = vector.shape_cast %349 : vector<1x8x32xf32> to vector<8x32xf32>
    %351 = arith.truncf %331 : vector<8x32xf32> to vector<8x32xbf16>
    %cst_158 = arith.constant dense<0.000000e+00> : vector<8x32xf32>
    %352 = tpu.matmul %351, %23, %cst_158 {dimension_numbers = #tpu.dot_dimension_numbers<[1], [0], [0], [1], [0, 0, 1, 1], [], []>} : vector<8x32xbf16>, vector<32x32xbf16>, vector<8x32xf32> -> vector<8x32xf32>
    %353 = arith.addf %341, %352 : vector<8x32xf32>
    %cst_159 = arith.constant dense<0.000000e+00> : vector<8x32xf32>
    %354 = tpu.matmul %351, %25, %cst_159 {dimension_numbers = #tpu.dot_dimension_numbers<[1], [0], [0], [1], [0, 0, 1, 1], [], []>} : vector<8x32xbf16>, vector<32x32xbf16>, vector<8x32xf32> -> vector<8x32xf32>
    %355 = arith.addf %344, %354 : vector<8x32xf32>
    %cst_160 = arith.constant dense<0.000000e+00> : vector<8x32xf32>
    %356 = tpu.matmul %351, %27, %cst_160 {dimension_numbers = #tpu.dot_dimension_numbers<[1], [0], [0], [1], [0, 0, 1, 1], [], []>} : vector<8x32xbf16>, vector<32x32xbf16>, vector<8x32xf32> -> vector<8x32xf32>
    %357 = arith.addf %347, %356 : vector<8x32xf32>
    %cst_161 = arith.constant dense<0.000000e+00> : vector<8x32xf32>
    %358 = tpu.matmul %351, %29, %cst_161 {dimension_numbers = #tpu.dot_dimension_numbers<[1], [0], [0], [1], [0, 0, 1, 1], [], []>} : vector<8x32xbf16>, vector<32x32xbf16>, vector<8x32xf32> -> vector<8x32xf32>
    %359 = arith.addf %350, %358 : vector<8x32xf32>
    %cst_162 = arith.constant 5.000000e-01 : f32
    %360 = vector.broadcast %cst_162 : f32 to vector<8x32xf32>
    %361 = arith.mulf %360, %353 : vector<8x32xf32>
    %362 = math.tanh %361 : vector<8x32xf32>
    %cst_163 = arith.constant 5.000000e-01 : f32
    %363 = vector.broadcast %cst_163 : f32 to vector<8x32xf32>
    %364 = arith.mulf %363, %362 : vector<8x32xf32>
    %cst_164 = arith.constant 5.000000e-01 : f32
    %365 = vector.broadcast %cst_164 : f32 to vector<8x32xf32>
    %366 = arith.addf %364, %365 : vector<8x32xf32>
    %cst_165 = arith.constant 5.000000e-01 : f32
    %367 = vector.broadcast %cst_165 : f32 to vector<8x32xf32>
    %368 = arith.mulf %367, %355 : vector<8x32xf32>
    %369 = math.tanh %368 : vector<8x32xf32>
    %cst_166 = arith.constant 5.000000e-01 : f32
    %370 = vector.broadcast %cst_166 : f32 to vector<8x32xf32>
    %371 = arith.mulf %370, %369 : vector<8x32xf32>
    %cst_167 = arith.constant 5.000000e-01 : f32
    %372 = vector.broadcast %cst_167 : f32 to vector<8x32xf32>
    %373 = arith.addf %371, %372 : vector<8x32xf32>
    %374 = math.tanh %357 : vector<8x32xf32>
    %cst_168 = arith.constant 5.000000e-01 : f32
    %375 = vector.broadcast %cst_168 : f32 to vector<8x32xf32>
    %376 = arith.mulf %375, %359 : vector<8x32xf32>
    %377 = math.tanh %376 : vector<8x32xf32>
    %cst_169 = arith.constant 5.000000e-01 : f32
    %378 = vector.broadcast %cst_169 : f32 to vector<8x32xf32>
    %379 = arith.mulf %378, %377 : vector<8x32xf32>
    %cst_170 = arith.constant 5.000000e-01 : f32
    %380 = vector.broadcast %cst_170 : f32 to vector<8x32xf32>
    %381 = arith.addf %379, %380 : vector<8x32xf32>
    %382 = arith.mulf %373, %334 : vector<8x32xf32>
    %383 = arith.mulf %366, %374 : vector<8x32xf32>
    %384 = arith.addf %382, %383 : vector<8x32xf32>
    %385 = math.tanh %384 : vector<8x32xf32>
    %386 = arith.mulf %381, %385 : vector<8x32xf32>
    %387 = arith.addi %31, %c5_i32 : i32
    %388 = vector.broadcast %387 : i32 to vector<8x1xi32>
    %389 = arith.cmpi slt, %388, %30 : vector<8x1xi32>
    %390 = vector.shape_cast %389 : vector<8x1xi1> to vector<8x1xi1>
    %391 = vector.broadcast %390 : vector<8x1xi1> to vector<8x32xi1>
    %392 = arith.select %391, %386, %331 : vector<8x32xi1>, vector<8x32xf32>
    %393 = vector.shape_cast %389 : vector<8x1xi1> to vector<8x1xi1>
    %394 = vector.broadcast %393 : vector<8x1xi1> to vector<8x32xi1>
    %395 = arith.select %394, %384, %334 : vector<8x32xi1>, vector<8x32xf32>
    %396 = arith.index_cast %c5_i32 : i32 to index
    %c0_171 = arith.constant 0 : index
    %c0_172 = arith.constant 0 : index
    %397 = vector.load %arg9[%396, %c0_171, %c0_172] : memref<6x8x32xf32, #tpu.memory_space<vmem>>, vector<1x8x32xf32>
    %398 = vector.shape_cast %397 : vector<1x8x32xf32> to vector<8x32xf32>
    %399 = vector.shape_cast %392 : vector<8x32xf32> to vector<1x8x32xf32>
    tpu.vector_store %arg9[%396, %c0_171, %c0_172], %399 {strides = array<i32>} : memref<6x8x32xf32, #tpu.memory_space<vmem>>, vector<1x8x32xf32>,
    %c6_i32_173 = arith.constant 6 : i32
    %c0_174 = arith.constant 0 : index
    %c0_175 = arith.constant 0 : index
    %400 = vector.load %arg12[%c0_174, %c0_175] : memref<8x32xf32, #tpu.memory_space<vmem>>, vector<8x32xf32>
    tpu.vector_store %arg12[%c0_174, %c0_175], %392 {strides = array<i32>} : memref<8x32xf32, #tpu.memory_space<vmem>>, vector<8x32xf32>,
    %c0_176 = arith.constant 0 : index
    %c0_177 = arith.constant 0 : index
    %401 = vector.load %arg13[%c0_176, %c0_177] : memref<8x32xf32, #tpu.memory_space<vmem>>, vector<8x32xf32>
    tpu.vector_store %arg13[%c0_176, %c0_177], %395 {strides = array<i32>} : memref<8x32xf32, #tpu.memory_space<vmem>>, vector<8x32xf32>,
    %c0_i32_178 = arith.constant 0 : i32
    %402 = arith.cmpi eq, %arg1, %c0_i32_178 : i32
    %403 = arith.extui %402 : i1 to i32
    %c0_i32_179 = arith.constant 0 : i32
    %404 = arith.cmpi ne, %403, %c0_i32_179 : i32
    scf.if %404 {
      %c0_180 = arith.constant 0 : index
      %c0_181 = arith.constant 0 : index
      %405 = vector.load %arg10[%c0_180, %c0_181] : memref<8x32xf32, #tpu.memory_space<vmem>>, vector<8x32xf32>
      tpu.vector_store %arg10[%c0_180, %c0_181], %392 {strides = array<i32>} : memref<8x32xf32, #tpu.memory_space<vmem>>, vector<8x32xf32>,
      %c0_182 = arith.constant 0 : index
      %c0_183 = arith.constant 0 : index
      %406 = vector.load %arg11[%c0_182, %c0_183] : memref<8x32xf32, #tpu.memory_space<vmem>>, vector<8x32xf32>
      tpu.vector_store %arg11[%c0_182, %c0_183], %395 {strides = array<i32>} : memref<8x32xf32, #tpu.memory_space<vmem>>, vector<8x32xf32>,
    } else {
    }
    return
  }
  func.func @transform_0(%arg0: i32, %arg1: i32) -> (i32, i32, i32) {
    %c0_i32 = arith.constant 0 : i32
    %c0_i32_0 = arith.constant 0 : i32
    return %arg1, %arg0, %c0_i32 : i32, i32, i32
  }
  func.func @transform_1(%arg0: i32, %arg1: i32) -> (i32, i32) {
    %c0_i32 = arith.constant 0 : i32
    %c0_i32_0 = arith.constant 0 : i32
    return %arg0, %c0_i32 : i32, i32
  }
  func.func @transform_2(%arg0: i32, %arg1: i32) -> (i32, i32) {
    %c0_i32 = arith.constant 0 : i32
    %c0_i32_0 = arith.constant 0 : i32
    return %arg0, %c0_i32 : i32, i32
  }
  func.func @transform_3(%arg0: i32, %arg1: i32) -> (i32, i32) {
    %c0_i32 = arith.constant 0 : i32
    %c0_i32_0 = arith.constant 0 : i32
    return %arg0, %c0_i32 : i32, i32
  }
  func.func @transform_4(%arg0: i32, %arg1: i32) -> (i32, i32) {
    %c0_i32 = arith.constant 0 : i32
    %c0_i32_0 = arith.constant 0 : i32
    %c0_i32_1 = arith.constant 0 : i32
    return %c0_i32, %c0_i32_0 : i32, i32
  }
  func.func @transform_5(%arg0: i32, %arg1: i32) -> (i32, i32, i32) {
    %c0_i32 = arith.constant 0 : i32
    %c0_i32_0 = arith.constant 0 : i32
    %c0_i32_1 = arith.constant 0 : i32
    %c0_i32_2 = arith.constant 0 : i32
    return %c0_i32, %c0_i32_0, %c0_i32_1 : i32, i32, i32
  }
  func.func @transform_6(%arg0: i32, %arg1: i32) -> (i32, i32) {
    %c0_i32 = arith.constant 0 : i32
    %c0_i32_0 = arith.constant 0 : i32
    %c0_i32_1 = arith.constant 0 : i32
    return %c0_i32, %c0_i32_0 : i32, i32
  }
  func.func @transform_7(%arg0: i32, %arg1: i32) -> (i32, i32, i32) {
    %c0_i32 = arith.constant 0 : i32
    %c0_i32_0 = arith.constant 0 : i32
    return %arg1, %arg0, %c0_i32 : i32, i32, i32
  }
  func.func @transform_8(%arg0: i32, %arg1: i32) -> (i32, i32) {
    %c0_i32 = arith.constant 0 : i32
    %c0_i32_0 = arith.constant 0 : i32
    return %arg0, %c0_i32 : i32, i32
  }
  func.func @transform_9(%arg0: i32, %arg1: i32) -> (i32, i32) {
    %c0_i32 = arith.constant 0 : i32
    %c0_i32_0 = arith.constant 0 : i32
    return %arg0, %c0_i32 : i32, i32
  }
}

</mosaic_0001>

<bundles_post_ra>
// kernel: tpu_custom_call.1
= control target key start
LH: loop header
LB: loop body
LE: loop exit
PB: predicated region body
PF: predicated region fallthrough
CT: control target
= control target key end

     0   :  { %15 = vsyncpa [#allocation9], 0  ;;  %s1641_s0 = inlined_call_operand.hbm [shape: bf16[6,8,32], index: 0, kind: input, shape index: {}]   ;;  %s1642_s1 = inlined_call_operand.vmem [shape: f32[8,32], index: 1, kind: input, shape index: {}]   ;;  %s1643_s2 = inlined_call_operand.hbm [shape: f32[8,32], index: 2, kind: input, shape index: {}]   ;;  %s1644_s3 = inlined_call_operand.vmem [shape: s32[8,1], index: 3, kind: input, shape index: {}]   ;;  %s1645_s4 = inlined_call_operand.hbm [shape: bf16[32,128], index: 4, kind: input, shape index: {}]   ;;  %s1646_s5 = inlined_call_operand.hbm [shape: bf16[4,32,32], index: 5, kind: input, shape index: {}]   ;;  %s1647_s6 = inlined_call_operand.vmem [shape: f32[1,128], index: 6, kind: input, shape index: {}]   ;;  %s1648_s7 = inlined_call_operand.hbm [shape: f32[6,8,32], index: 7, kind: output, shape index: {0}]   ;;  %s1649_s8 = inlined_call_operand.hbm [shape: f32[8,32], index: 8, kind: output, shape index: {1}]   ;;  %s1650_s9 = inlined_call_operand.hbm [shape: f32[8,32], index: 9, kind: output, shape index: {2}]  }
   0x1   :  { %16 = vsyncpa [#allocation12], 0 }
   0x2   :  { %17 = vsyncpa [#allocation15], 0 }
   0x3   :  { %18 = vsyncpa [#allocation10], 0  ;;  %s40_s11 = sshll.u32 %s1643_s2, 4  ;;  %s41_s11 = int_to_ptr.hbm [resolvable:$true] %s40_s11 }
   0x4   :  { %19 = vsyncpa [#allocation18], 0  ;;  %s1327_s12 = smov [#allocation11]   ;;  %s24_s16 = sshll.u32 %s1641_s0, 4  ;;  %s25_s16 = int_to_ptr.hbm [resolvable:$true] %s24_s16 }
   0x5   :  { %s42_s13 = sshll.u32 %s1327_s12, 4  ;;  %s1328_s17 = smov [#allocation8]   ;;  %s43_s13 = int_to_ptr.vmem [resolvable:$true] %s42_s13 }
   0x6   :  { %45 = dma.hbm_to_vmem [thread:$0]  %s41_s11, 128, %s43_s13, [#allocation12]  }
   0x7   :  { %s26_s18 = sshll.u32 %s1328_s17, 4  ;;  %s1329_s19 = smov 64   ;;  %s27_s18 = int_to_ptr.vmem [resolvable:$true] %s26_s18 }
   0x8   :  { %s1330_s20 = smov 4   ;;  %s52_s22 = sshll.u32 %s1645_s4, 4  ;;  %s53_s22 = int_to_ptr.hbm [resolvable:$true] %s52_s22 }
   0x9   :  { %32 = dma.hbm_to_vmem [thread:$0]  %s25_s16, 384, %s27_s18, [#allocation9], %s1329_s19, %s1329_s19, %s1330_s20  }
   0xa   :  { %s1331_s23 = smov [#allocation13]   ;;  %s65_s26 = sshll.u32 %s1646_s5, 4  ;;  %s66_s26 = int_to_ptr.hbm [resolvable:$true] %s65_s26 }
   0xb   :  { %s54_s24 = sshll.u32 %s1331_s23, 4  ;;  %s1332_s27 = smov [#allocation14]   ;;  %s55_s24 = int_to_ptr.vmem [resolvable:$true] %s54_s24 }
   0xc   :  { %60 = dma.hbm_to_vmem [thread:$0]  %s53_s22, 256, %s55_s24, [#allocation12], %s1329_s19, %s1329_s19, %s1330_s20  }
   0xd   :  { %s67_s28 = sshll.u32 %s1332_s27, 4  ;;  %s68_s28 = int_to_ptr.vmem [resolvable:$true] %s67_s28 }
   0xe   :  { %73 = dma.hbm_to_vmem [thread:$0]  %s66_s26, 1024, %s68_s28, [#allocation15], %s1329_s19, %s1329_s19, %s1330_s20  }
   0xf   :  { %1317 = dma.done.wait [#allocation9], 384  }
  0x10   :  { %1318 = vsyncadd [#allocation9], 4294966912 }
  0x11   :  { %1319 = dma.done.wait [#allocation12], 384  }
  0x12   :  { %1320 = vsyncadd [#allocation12], 4294966912 }
  0x13   :  { %1321 = dma.done.wait [#allocation15], 1024  }
  0x14   :  { %1322 = vsyncadd [#allocation15], 4294966272  ;;  %vm98_vm0 = vcmask 261120   ;;  %v1062_v0 = vld [vmem:[#allocation13 + $0x8] sm:$0xff]  ;;  %v1409_v1 = vld [vmem:[#allocation14 + $0x8] sm:$0xff]  ;;  %v1333_v14 = vmov 0  }
  0x15   :  { %v97_v2 = vld [vmem:[%s1642_s1] sm:$0xff]  ;;  %159 = vmatpush.bf16.msra.mxu0 %v1062_v0  ;;  %v1061_v3 = vld [vmem:[#allocation13] sm:$0xff]  ;;  %v1415_v4 = vld [vmem:[#allocation14 + $0x18] sm:$0xff]  ;;  %310 = vmatpush.bf16.msra.mxu1 %v1409_v1  ;;  %s1334_s30 = smov 32   ;;  %s1335_s10 = smov 96  }
  0x16   :  { %99 = vst.msk [vmem:[#allocation2] sm:$0xff] %vm98_vm0, %v97_v2  ;;  %v1417_v5 = vld [vmem:[#allocation14 + $0x28] sm:$0xff]  ;;  %v1420_v6 = vld [vmem:[#allocation14] sm:$0xff]  ;;  %336 = vmatpush.bf16.msra.mxu2 %v1415_v4  ;;  %v1423_v7 = vld [vmem:[#allocation14 + $0x10] sm:$0xff]  ;;  %1085 = vset.pattern.permute.xlu1 %v1333_v14  ;;  %s927_s15 = sshll.u32 %s1648_s7, 4  ;;  %s1337_s16 = smov [#allocation17]   ;;  %s928_s15 = int_to_ptr.hbm [resolvable:$true] %s927_s15 }
  0x17   :  { %362 = vmatpush.bf16.msra.mxu3 %v1417_v5  ;;  %v1426_v8 = vld [vmem:[#allocation14 + $0x20] sm:$0xff]  ;;  %v1058_v9 = vld [vmem:[#allocation8] sm:$0xff]  ;;  %v1428_v10 = vld [vmem:[#allocation14 + $0x38] sm:$0xff]  ;;  %1086 = vset.pattern.permute.xlu2 %v1333_v14  ;;  %s939_s17 = sshll.u32 %s1337_s16, 4  ;;  %s941_s20 = sshll.u32 %s1649_s8, 4  ;;  %s940_s17 = int_to_ptr.vmem [resolvable:$true] %s939_s17  ;;  %s942_s20 = int_to_ptr.hbm [resolvable:$true] %s941_s20 }
  0x18   :  { %v1438_v12 = vld [vmem:[#allocation14 + $0x30] sm:$0xff]  ;;  %1087 = vset.pattern.permute.xlu0 %v1333_v14  ;;  %v1468_v15 = vld [vmem:[%s1647_s6] ss:$0 sm:$0xff]  ;;  %v100_v30 = vld [vmem:[#allocation11] sm:$0xff]  ;;  %s1338_s2 = smov [#allocation19]   ;;  %s952_s24 = sshll.u32 %s1650_s9, 4  ;;  %s953_s24 = int_to_ptr.hbm [resolvable:$true] %s952_s24 }
  0x19   :  { %160 = vmatpush.bf16.msra.mxu0 %v1061_v3  ;;  %311 = vmatpush.bf16.msra.mxu1 %v1420_v6  ;;  %v1477_v19 = vld [vmem:[%s1644_s3] sm:$0xff]  ;;  %101 = vst.msk [vmem:[#allocation3] sm:$0xff] %vm98_vm0, %v100_v30  ;;  %v1059_v60 = vld [vmem:[#allocation8 + $0x8] sm:$0xff]  ;;  %s1336_s3 = smov [#allocation16]   ;;  %s950_s21 = sshll.u32 %s1338_s2, 4  ;;  %s951_s21 = int_to_ptr.vmem [resolvable:$true] %s950_s21 }
  0x1a   :  { %337 = vmatpush.bf16.msra.mxu2 %v1423_v7  ;;  %vm1032_vm1 = vcmp.gt.s32.totalorder %v1477_v19, 0  ;;  %vm1037_vm2 = vcmp.gt.s32.totalorder %v1477_v19, 1  ;;  %vm1042_vm4 = vcmp.gt.s32.totalorder %v1477_v19, 2  ;;  %vm1052_vm6 = vcmp.gt.s32.totalorder %v1477_v19, 4  ;;  %s925_s6 = sshll.u32 %s1336_s3, 4  ;;  %s1339_s7 = smov 128   ;;  %s926_s6 = int_to_ptr.vmem [resolvable:$true] %s925_s6 }
  0x1b   :  { %363 = vmatpush.bf16.msra.mxu3 %v1426_v8  ;;  %v416_v22 = vsel %vm1032_vm1, 1, %v1333_v14  ;;  %v513_v24 = vsel %vm1037_vm2, 1, %v1333_v14  ;;  %vm1047_vm7 = vcmp.gt.s32.totalorder %v1477_v19, 3  ;;  %vm1057_vm8 = vcmp.gt.s32.totalorder %v1477_v19, 5  ;;  %s1340_s8 = smov 8  }
  0x1c   :  { %993 = vmatmul.msk.bf16.vlgmr.msra.gmra.mxu0 %vm98_vm0, %v1058_v9 }
  0x1d   :  { %554 = vmatpush.bf16.msrb.mxu0 %v1415_v4  ;;  %v1435_v11 = vld [vmem:[#allocation2] sm:$0xff]  ;;  %388 = vmatpush.bf16.msrb.mxu1 %v1428_v10 }
  0x1e   :  { %v288_v13 = vpack.c.bf16 %v1435_v11, %v1435_v11  ;;  %442 = vmatpush.bf16.msrb.mxu2 %v1409_v1 }
  0x1f   :  { %456 = vmatpush.bf16.msrb.mxu3 %v1415_v4 }
  0x20   :  { %1004 = vmatmul.msk.bf16.vlgmr.msra.gmra.mxu1 %vm98_vm0, %v288_v13  ;;  %1013 = vmatmul.msk.bf16.vlgmr.msra.gmra.mxu2 %vm98_vm0, %v288_v13  ;;  %v283_v54 = vld [vmem:[#allocation3] sm:$0xff] }
  0x21   :  { %555 = vmatpush.bf16.msrb.mxu0 %v1423_v7  ;;  %1022 = vmatmul.msk.bf16.vlgmr.msra.gmra.mxu3 %vm98_vm0, %v288_v13 }
  0x22   :  { %389 = vmatpush.bf16.msrb.mxu1 %v1438_v12  ;;  %443 = vmatpush.bf16.msrb.mxu2 %v1420_v6 }
  0x23   :  { %457 = vmatpush.bf16.msrb.mxu3 %v1423_v7 }
  0x25   :  { %652 = vmatpush.bf16.msra.mxu0 %v1415_v4 }
  0x26   :  { %470 = vmatpush.bf16.msra.mxu1 %v1417_v5  ;;  %484 = vmatpush.bf16.msra.mxu2 %v1428_v10 }
  0x27   :  { %540 = vmatpush.bf16.msra.mxu3 %v1409_v1 }
  0x29   :  { %653 = vmatpush.bf16.msra.mxu0 %v1423_v7 }
  0x2a   :  { %471 = vmatpush.bf16.msra.mxu1 %v1426_v8  ;;  %485 = vmatpush.bf16.msra.mxu2 %v1438_v12 }
  0x2b   :  { %541 = vmatpush.bf16.msra.mxu3 %v1420_v6 }
  0x2c   :  { %994 = vmatmul.msk.bf16.gmra.mxu0 %vm98_vm0, %v1059_v60 }
  0x30   :  { %1031 = vmatmul.msk.bf16.vlgmr.msrb.gmra.mxu1 %vm98_vm0, %v288_v13 }
  0x31   :  { %568 = vmatpush.bf16.msrb.mxu1 %v1417_v5 }
  0x35   :  { %569 = vmatpush.bf16.msrb.mxu1 %v1426_v8 }
  0x99   :  { %v162_v16 = vpop.f32.mrf.mxu0 }
  0x9a   :  { %v163_v17 = vadd.f32 %v1468_v15, %v162_v16 }
  0x9c   :  { %177 = vst.msk [vmem:[#allocation4] sm:$0xff] %vm98_vm0, %v163_v17  ;;  %237 = vrot.lane.b32.xlu1 %v163_v17, %s1334_s30  ;;  %189 = vrot.lane.b32.xlu0 %v163_v17, %s1335_s10 }
  0x9d   :  { %v313_v18 = vpop.f32.mrf.mxu1 }
  0xa1   :  { %v164_v20 = vpop.f32.mrf.mxu0 }
  0xa2   :  { %v165_v21 = vadd.f32 %v1468_v15, %v164_v20 }
  0xa3   :  { %v339_v25 = vpop.f32.mrf.mxu2  ;;  %v284_v34 = vld [vmem:[#allocation4] sm:$0xff] }
  0xa4   :  { %178 = vst.msk [vmem:[#allocation4 + $0x8] sm:$0xff] %vm98_vm0, %v165_v21  ;;  %191 = vrot.lane.b32.xlu2 %v165_v21, %s1335_s10  ;;  %213 = vrot.lane.b32.xlu0 %v163_v17, %s1329_s19  ;;  %v365_v26 = vpop.f32.mrf.mxu3  ;;  %v317_v37 = vadd.f32 %v313_v18, %v284_v34  ;;  %v1060_v17 = vld [vmem:[#allocation8 + $0x10] sm:$0xff]  ;;  %v611_v34 = vsel %vm1042_vm4, 1, %v1333_v14 }
  0xa5   :  { %v315_v23 = vpop.f32.mrf.mxu1  ;;  %418 = vperm.xlu1 %1085, %v416_v22   ;;  %995 = vmatmul.msk.bf16.gmra.mxu0 %vm98_vm0, %v1060_v17 }
  0xa6   :  { %v396_v38 = vmul.f32 0.5, %v317_v37 }
  0xa8   :  { %1089 = vtanh.f32 %v396_v38 }
  0xab   :  { %v341_v28 = vpop.f32.mrf.mxu2  ;;  %v425_v18 = vld [vmem:[#allocation4 + $0x8] sm:$0xff] }
  0xac   :  { %215 = vrot.lane.b32.xlu2 %v165_v21, %s1329_s19  ;;  %239 = vrot.lane.b32.xlu0 %v165_v21, %s1334_s30  ;;  %v367_v31 = vpop.f32.mrf.mxu3 }
  0xad   :  { %515 = vperm.xlu1 %1085, %v513_v24   ;;  %v391_v27 = vpop.f32.mrf.mxu1 }
  0xae   :  { %v1090_v47 = vpop.eup %1089 }
  0xaf   :  { %v398_v51 = vmul.f32 0.5, %v1090_v47 }
  0xb1   :  { %v399_v55 = vadd.f32 0.5, %v398_v51 }
  0xb5   :  { %v393_v32 = vpop.f32.mrf.mxu1 }
  0xfe   :  { %v192_v29 = vpop.permute.xlu2 %191 }
  0xff   :  { %208 = vst.msk [vmem:[#allocation5 + $0x8] sm:$0xff] %vm98_vm0, %v192_v29 }
 0x106   :  { %v216_v33 = vpop.permute.xlu2 %215  ;;  %v427_v21 = vld [vmem:[#allocation5 + $0x8] sm:$0xff] }
 0x107   :  { %232 = vst.msk [vmem:[#allocation6 + $0x8] sm:$0xff] %vm98_vm0, %v216_v33 }
 0x10e   :  { %v238_v35 = vpop.permute.xlu1 %237  ;;  %v190_v36 = vpop.permute.xlu0 %189  ;;  %v429_v30 = vld [vmem:[#allocation6 + $0x8] sm:$0xff] }
 0x10f   :  { %255 = vst.msk [vmem:[#allocation7] sm:$0xff] %vm98_vm0, %v238_v35 }
 0x110   :  { %207 = vst.msk [vmem:[#allocation5] sm:$0xff] %vm98_vm0, %v190_v36 }
 0x116   :  { %v214_v39 = vpop.permute.xlu0 %213  ;;  %v287_v42 = vld [vmem:[#allocation7] sm:$0xff] }
 0x117   :  { %v285_v40 = vld [vmem:[#allocation5] sm:$0xff]  ;;  %231 = vst.msk [vmem:[#allocation6] sm:$0xff] %vm98_vm0, %v214_v39  ;;  %v395_v44 = vadd.f32 %v391_v27, %v287_v42  ;;  %v419_v56 = vpop.permute.xlu1 %418 }
 0x118   :  { %v343_v41 = vadd.f32 %v339_v25, %v285_v40  ;;  %vm420_vm3 = vcmp.eq.s32.totalorder %v419_v56, 1  ;;  %v167_v25 = vpop.f32.mrf.mxu0 }
 0x119   :  { %v405_v49 = vmul.f32 0.5, %v395_v44  ;;  %v168_v29 = vadd.f32 %v1468_v15, %v167_v25 }
 0x11a   :  { %v400_v43 = vmul.f32 0.5, %v343_v41 }
 0x11b   :  { %179 = vst.msk [vmem:[#allocation4 + $0x10] sm:$0xff] %vm98_vm0, %v168_v29  ;;  %193 = vrot.lane.b32.xlu2 %v168_v29, %s1335_s10  ;;  %217 = vrot.lane.b32.xlu0 %v168_v29, %s1329_s19 }
 0x11c   :  { %1091 = vtanh.f32 %v400_v43  ;;  %241 = vrot.lane.b32.xlu1 %v168_v29, %s1334_s30 }
 0x11e   :  { %v286_v45 = vld [vmem:[#allocation6] sm:$0xff]  ;;  %v240_v46 = vpop.permute.xlu0 %239 }
 0x11f   :  { %v369_v48 = vadd.f32 %v365_v26, %v286_v45  ;;  %256 = vst.msk [vmem:[#allocation7 + $0x8] sm:$0xff] %vm98_vm0, %v240_v46  ;;  %v516_v47 = vpop.permute.xlu1 %515 }
 0x120   :  { %v169_v35 = vpop.f32.mrf.mxu0  ;;  %vm517_vm5 = vcmp.eq.s32.totalorder %v516_v47, 1 }
 0x121   :  { %1093 = vtanh.f32 %v369_v48  ;;  %v170_v37 = vadd.f32 %v1468_v15, %v169_v35  ;;  %v905_v35 = vsel %vm1057_vm8, 1, %v1333_v14 }
 0x122   :  { %v1092_v50 = vpop.eup %1091  ;;  %1095 = vtanh.f32 %v405_v49 }
 0x123   :  { %v402_v52 = vmul.f32 0.5, %v1092_v50  ;;  %613 = vperm.xlu2 %1086, %v611_v34   ;;  %180 = vst.msk [vmem:[#allocation4 + $0x18] sm:$0xff] %vm98_vm0, %v170_v37  ;;  %195 = vrot.lane.b32.xlu0 %v170_v37, %s1335_s10 }
 0x124   :  { %219 = vrot.lane.b32.xlu1 %v170_v37, %s1329_s19 }
 0x125   :  { %v403_v53 = vadd.f32 0.5, %v402_v52 }
 0x126   :  { %v431_v45 = vld [vmem:[#allocation7 + $0x8] sm:$0xff] }
 0x127   :  { %v1094_v57 = vpop.eup %1093  ;;  %v409_v59 = vmul.f32 %v403_v53, %v283_v54 }
 0x128   :  { %v410_v58 = vmul.f32 %v1094_v57, %v399_v55  ;;  %v1096_v61 = vpop.eup %1095  ;;  %v172_v50 = vpop.f32.mrf.mxu0 }
 0x129   :  { %v407_v0 = vmul.f32 0.5, %v1096_v61  ;;  %v173_v53 = vadd.f32 %v1468_v15, %v172_v50  ;;  %v807_v61 = vsel %vm1052_vm6, 1, %v1333_v14 }
 0x12a   :  { %v411_v62 = vadd.f32 %v410_v58, %v409_v59 }
 0x12b   :  { %v408_v2 = vadd.f32 0.5, %v407_v0  ;;  %243 = vrot.lane.b32.xlu2 %v170_v37, %s1334_s30  ;;  %181 = vst.msk [vmem:[#allocation4 + $0x20] sm:$0xff] %vm98_vm0, %v173_v53 }
 0x12c   :  { %1097 = vtanh.f32 %v411_v62  ;;  %v1497_v63 = vsel %vm420_vm3, %v411_v62, %v283_v54  ;;  %197 = vrot.lane.b32.xlu1 %v173_v53, %s1335_s10 }
 0x130   :  { %v174_v0 = vpop.f32.mrf.mxu0 }
 0x132   :  { %v1098_v3 = vpop.eup %1097 }
 0x133   :  { %v413_v9 = vmul.f32 %v1098_v3, %v408_v2  ;;  %221 = vrot.lane.b32.xlu2 %v173_v53, %s1329_s19  ;;  %v709_v2 = vsel %vm1047_vm7, 1, %v1333_v14  ;;  %v175_v3 = vadd.f32 %v1468_v15, %v174_v0 }
 0x134   :  { %245 = vrot.lane.b32.xlu1 %v173_v53, %s1334_s30  ;;  %711 = vperm.xlu0 %1087, %v709_v2  }
 0x135   :  { %v1500_v13 = vsel %vm420_vm3, %v413_v9, %v1435_v11  ;;  %182 = vst.msk [vmem:[#allocation4 + $0x28] sm:$0xff] %vm98_vm0, %v175_v3 }
 0x136   :  { %423 = vst.msk [vmem:[#allocation16] sm:$0xff] %vm98_vm0, %v1500_v13  ;;  %v432_v16 = vpack.c.bf16 %v1500_v13, %v1500_v13 }
 0x138   :  { %1033 = vmatmul.msk.bf16.vlgmr.msrb.gmra.mxu2 %vm98_vm0, %v432_v16  ;;  %1034 = vmatmul.msk.bf16.vlgmr.msrb.gmra.mxu3 %vm98_vm0, %v432_v16 }
 0x139   :  { %1035 = vmatmul.msk.bf16.vlgmr.msra.gmra.mxu1 %vm98_vm0, %v432_v16  ;;  %582 = vmatpush.bf16.msrb.mxu2 %v1428_v10 }
 0x13a   :  { %638 = vmatpush.bf16.msrb.mxu3 %v1409_v1  ;;  %666 = vmatpush.bf16.msra.mxu1 %v1417_v5 }
 0x13b   :  { %809 = vperm.xlu2 %1086, %v807_v61  }
 0x13c   :  { %223 = vrot.lane.b32.xlu1 %v175_v3, %s1329_s19  ;;  %199 = vrot.lane.b32.xlu0 %v175_v3, %s1335_s10 }
 0x13d   :  { %583 = vmatpush.bf16.msrb.mxu2 %v1438_v12 }
 0x13e   :  { %639 = vmatpush.bf16.msrb.mxu3 %v1420_v6  ;;  %667 = vmatpush.bf16.msra.mxu1 %v1426_v8 }
 0x143   :  { %247 = vrot.lane.b32.xlu2 %v175_v3, %s1334_s30 }
 0x144   :  { %907 = vperm.xlu0 %1087, %v905_v35  }
 0x148   :  { %1036 = vmatmul.msk.bf16.vlgmr.msra.gmra.mxu2 %vm98_vm0, %v432_v16 }
 0x149   :  { %680 = vmatpush.bf16.msra.mxu2 %v1428_v10 }
 0x14d   :  { %681 = vmatpush.bf16.msra.mxu2 %v1438_v12 }
 0x175   :  { %v194_v9 = vpop.permute.xlu2 %193 }
 0x176   :  { %209 = vst.msk [vmem:[#allocation5 + $0x10] sm:$0xff] %vm98_vm0, %v194_v9  ;;  %v621_v9 = vld [vmem:[#allocation4 + $0x18] sm:$0xff] }
 0x18d   :  { %v218_v17 = vpop.permute.xlu0 %217 }
 0x18e   :  { %233 = vst.msk [vmem:[#allocation6 + $0x10] sm:$0xff] %vm98_vm0, %v218_v17  ;;  %v242_v15 = vpop.permute.xlu1 %241 }
 0x18f   :  { %257 = vst.msk [vmem:[#allocation7 + $0x10] sm:$0xff] %vm98_vm0, %v242_v15 }
 0x1b6   :  { %v473_v11 = vpop.f32.mrf.mxu1 }
 0x1b7   :  { %v477_v31 = vadd.f32 %v473_v11, %v429_v30  ;;  %v220_v11 = vpop.permute.xlu1 %219  ;;  %v529_v30 = vld [vmem:[#allocation7 + $0x10] sm:$0xff] }
 0x1b8   :  { %234 = vst.msk [vmem:[#allocation6 + $0x18] sm:$0xff] %vm98_vm0, %v220_v11 }
 0x1bb   :  { %v445_v20 = vpop.f32.mrf.mxu2  ;;  %v459_v22 = vpop.f32.mrf.mxu3 }
 0x1bc   :  { %v449_v23 = vadd.f32 %v445_v20, %v425_v18  ;;  %v463_v24 = vadd.f32 %v459_v22, %v427_v21  ;;  %v196_v18 = vpop.permute.xlu0 %195  ;;  %v525_v21 = vld [vmem:[#allocation5 + $0x10] sm:$0xff] }
 0x1bd   :  { %210 = vst.msk [vmem:[#allocation5 + $0x18] sm:$0xff] %vm98_vm0, %v196_v18 }
 0x1be   :  { %v492_v26 = vmul.f32 0.5, %v449_v23  ;;  %v496_v27 = vmul.f32 0.5, %v463_v24  ;;  %v475_v28 = vpop.f32.mrf.mxu1 }
 0x1bf   :  { %v625_v11 = vld [vmem:[#allocation6 + $0x18] sm:$0xff] }
 0x1c0   :  { %1099 = vtanh.f32 %v492_v26 }
 0x1c1   :  { %1101 = vtanh.f32 %v496_v27  ;;  %v523_v27 = vld [vmem:[#allocation4 + $0x10] sm:$0xff] }
 0x1c2   :  { %1103 = vtanh.f32 %v477_v31 }
 0x1c3   :  { %v447_v32 = vpop.f32.mrf.mxu2  ;;  %v461_v33 = vpop.f32.mrf.mxu3 }
 0x1c4   :  { %v198_v32 = vpop.permute.xlu1 %197  ;;  %v527_v33 = vld [vmem:[#allocation6 + $0x10] sm:$0xff] }
 0x1c5   :  { %211 = vst.msk [vmem:[#allocation5 + $0x20] sm:$0xff] %vm98_vm0, %v198_v32 }
 0x1c6   :  { %v1100_v36 = vpop.eup %1099 }
 0x1c7   :  { %v1102_v38 = vpop.eup %1101  ;;  %v494_v39 = vmul.f32 0.5, %v1100_v36 }
 0x1c8   :  { %v498_v40 = vmul.f32 0.5, %v1102_v38  ;;  %v1104_v42 = vpop.eup %1103 }
 0x1c9   :  { %v495_v41 = vadd.f32 0.5, %v494_v39 }
 0x1ca   :  { %v499_v43 = vadd.f32 0.5, %v498_v40 }
 0x1cb   :  { %v506_v44 = vmul.f32 %v1104_v42, %v495_v41  ;;  %v487_v46 = vpop.f32.mrf.mxu2 }
 0x1cc   :  { %v505_v48 = vmul.f32 %v499_v43, %v1497_v63  ;;  %v491_v49 = vadd.f32 %v487_v46, %v431_v45  ;;  %v246_v45 = vpop.permute.xlu1 %245 }
 0x1cd   :  { %259 = vst.msk [vmem:[#allocation7 + $0x20] sm:$0xff] %vm98_vm0, %v246_v45 }
 0x1ce   :  { %v507_v51 = vadd.f32 %v506_v44, %v505_v48  ;;  %v501_v52 = vmul.f32 0.5, %v491_v49 }
 0x1d0   :  { %v1536_v54 = vsel %vm517_vm5, %v507_v51, %v1497_v63  ;;  %1105 = vtanh.f32 %v501_v52 }
 0x1d1   :  { %1107 = vtanh.f32 %v507_v51 }
 0x1d3   :  { %v489_v55 = vpop.f32.mrf.mxu2 }
 0x1d4   :  { %v224_v61 = vpop.permute.xlu1 %223 }
 0x1d5   :  { %236 = vst.msk [vmem:[#allocation6 + $0x28] sm:$0xff] %vm98_vm0, %v224_v61 }
 0x1d6   :  { %v1106_v56 = vpop.eup %1105 }
 0x1d7   :  { %v503_v57 = vmul.f32 0.5, %v1106_v56  ;;  %v1108_v59 = vpop.eup %1107 }
 0x1d9   :  { %v504_v58 = vadd.f32 0.5, %v503_v57 }
 0x1db   :  { %v509_v60 = vmul.f32 %v1108_v59, %v504_v58 }
 0x1dd   :  { %v1545_v62 = vsel %vm517_vm5, %v509_v60, %v1500_v13  ;;  %v1571_v13 = vpop.permute.xlu2 %613  ;;  %v1589_v60 = vpop.permute.xlu0 %711 }
 0x1de   :  { %521 = vst.msk [vmem:[#allocation16 + $0x8] sm:$0xff] %vm98_vm0, %v1545_v62  ;;  %v530_v63 = vpack.c.bf16 %v1545_v62, %v1545_v62  ;;  %vm615_vm9 = vcmp.eq.s32.totalorder %v1571_v13, 1  ;;  %vm713_vm10 = vcmp.eq.s32.totalorder %v1589_v60, 1 }
 0x1e0   :  { %1038 = vmatmul.msk.bf16.vlgmr.msra.gmra.mxu3 %vm98_vm0, %v530_v63  ;;  %1039 = vmatmul.msk.bf16.vlgmr.msrb.gmra.mxu0 %vm98_vm0, %v530_v63 }
 0x1e1   :  { %1040 = vmatmul.msk.bf16.vlgmr.msrb.gmra.mxu1 %vm98_vm0, %v530_v63  ;;  %1041 = vmatmul.msk.bf16.vlgmr.msrb.gmra.mxu2 %vm98_vm0, %v530_v63 }
 0x1e2   :  { %736 = vmatpush.bf16.msra.mxu3 %v1409_v1  ;;  %750 = vmatpush.bf16.msrb.mxu0 %v1415_v4 }
 0x1e3   :  { %764 = vmatpush.bf16.msrb.mxu1 %v1417_v5  ;;  %778 = vmatpush.bf16.msrb.mxu2 %v1428_v10 }
 0x1e5   :  { %v244_v16 = vpop.permute.xlu2 %243 }
 0x1e6   :  { %737 = vmatpush.bf16.msra.mxu3 %v1420_v6  ;;  %751 = vmatpush.bf16.msrb.mxu0 %v1423_v7  ;;  %258 = vst.msk [vmem:[#allocation7 + $0x18] sm:$0xff] %vm98_vm0, %v244_v16 }
 0x1e7   :  { %765 = vmatpush.bf16.msrb.mxu1 %v1426_v8  ;;  %779 = vmatpush.bf16.msrb.mxu2 %v1438_v12 }
 0x1ed   :  { %v222_v20 = vpop.permute.xlu2 %221  ;;  %v627_v15 = vld [vmem:[#allocation7 + $0x18] sm:$0xff] }
 0x1ee   :  { %235 = vst.msk [vmem:[#allocation6 + $0x20] sm:$0xff] %vm98_vm0, %v222_v20 }
 0x1f5   :  { %v1579_v25 = vpop.permute.xlu2 %809 }
 0x1f6   :  { %vm811_vm11 = vcmp.eq.s32.totalorder %v1579_v25, 1 }
 0x1fd   :  { %v248_v39 = vpop.permute.xlu2 %247 }
 0x1fe   :  { %260 = vst.msk [vmem:[#allocation7 + $0x28] sm:$0xff] %vm98_vm0, %v248_v39 }
 0x25d   :  { %v557_v22 = vpop.f32.mrf.mxu0 }
 0x25e   :  { %v561_v23 = vadd.f32 %v557_v22, %v525_v21  ;;  %v571_v24 = vpop.f32.mrf.mxu1 }
 0x25f   :  { %v575_v41 = vadd.f32 %v571_v24, %v527_v33 }
 0x260   :  { %v594_v26 = vmul.f32 0.5, %v561_v23 }
 0x262   :  { %1109 = vtanh.f32 %v594_v26 }
 0x263   :  { %v543_v28 = vpop.f32.mrf.mxu3 }
 0x264   :  { %v547_v29 = vadd.f32 %v543_v28, %v523_v27  ;;  %v585_v31 = vpop.f32.mrf.mxu2 }
 0x265   :  { %v559_v34 = vpop.f32.mrf.mxu0  ;;  %v589_v38 = vadd.f32 %v585_v31, %v529_v30 }
 0x266   :  { %v590_v36 = vmul.f32 0.5, %v547_v29  ;;  %v573_v37 = vpop.f32.mrf.mxu1 }
 0x267   :  { %v599_v43 = vmul.f32 0.5, %v589_v38 }
 0x268   :  { %v1110_v40 = vpop.eup %1109  ;;  %1111 = vtanh.f32 %v590_v36 }
 0x269   :  { %v596_v42 = vmul.f32 0.5, %v1110_v40  ;;  %1113 = vtanh.f32 %v575_v41  ;;  %v721_v40 = vld [vmem:[#allocation5 + $0x20] sm:$0xff] }
 0x26a   :  { %1115 = vtanh.f32 %v599_v43 }
 0x26b   :  { %v545_v19 = vpop.f32.mrf.mxu3  ;;  %v597_v46 = vadd.f32 0.5, %v596_v42 }
 0x26c   :  { %v587_v44 = vpop.f32.mrf.mxu2 }
 0x26d   :  { %v603_v50 = vmul.f32 %v597_v46, %v1536_v54  ;;  %v719_v44 = vld [vmem:[#allocation4 + $0x20] sm:$0xff] }
 0x26e   :  { %v1112_v14 = vpop.eup %1111 }
 0x26f   :  { %v592_v47 = vmul.f32 0.5, %v1112_v14  ;;  %v1114_v49 = vpop.eup %1113 }
 0x270   :  { %v1116_v52 = vpop.eup %1115 }
 0x271   :  { %v593_v48 = vadd.f32 0.5, %v592_v47  ;;  %v601_v56 = vmul.f32 0.5, %v1116_v52 }
 0x273   :  { %v604_v51 = vmul.f32 %v1114_v49, %v593_v48  ;;  %v602_v57 = vadd.f32 0.5, %v601_v56  ;;  %v725_v49 = vld [vmem:[#allocation7 + $0x20] sm:$0xff] }
 0x275   :  { %v605_v53 = vadd.f32 %v604_v51, %v603_v50  ;;  %v723_v51 = vld [vmem:[#allocation6 + $0x20] sm:$0xff] }
 0x277   :  { %1117 = vtanh.f32 %v605_v53  ;;  %v617_v55 = vsel %vm615_vm9, %v605_v53, %v1536_v54  ;;  %v200_v54 = vpop.permute.xlu0 %199 }
 0x278   :  { %212 = vst.msk [vmem:[#allocation5 + $0x28] sm:$0xff] %vm98_vm0, %v200_v54 }
 0x27d   :  { %v1118_v58 = vpop.eup %1117 }
 0x27e   :  { %v607_v59 = vmul.f32 %v1118_v58, %v602_v57 }
 0x27f   :  { %v819_v25 = vld [vmem:[#allocation5 + $0x28] sm:$0xff] }
 0x280   :  { %v616_v63 = vsel %vm615_vm9, %v607_v59, %v1545_v62  ;;  %v623_v62 = vld [vmem:[#allocation5 + $0x18] sm:$0xff] }
 0x281   :  { %619 = vst.msk [vmem:[#allocation16 + $0x10] sm:$0xff] %vm98_vm0, %v616_v63  ;;  %v628_v0 = vpack.c.bf16 %v616_v63, %v616_v63 }
 0x283   :  { %1043 = vmatmul.msk.bf16.vlgmr.msrb.gmra.mxu3 %vm98_vm0, %v628_v0  ;;  %1044 = vmatmul.msk.bf16.vlgmr.msra.gmra.mxu0 %vm98_vm0, %v628_v0 }
 0x284   :  { %1045 = vmatmul.msk.bf16.vlgmr.msra.gmra.mxu1 %vm98_vm0, %v628_v0  ;;  %1046 = vmatmul.msk.bf16.vlgmr.msra.gmra.mxu2 %vm98_vm0, %v628_v0 }
 0x285   :  { %834 = vmatpush.bf16.msrb.mxu3 %v1409_v1  ;;  %848 = vmatpush.bf16.msra.mxu0 %v1415_v4 }
 0x286   :  { %862 = vmatpush.bf16.msra.mxu1 %v1417_v5  ;;  %876 = vmatpush.bf16.msra.mxu2 %v1428_v10 }
 0x289   :  { %835 = vmatpush.bf16.msrb.mxu3 %v1420_v6  ;;  %849 = vmatpush.bf16.msra.mxu0 %v1423_v7 }
 0x28a   :  { %863 = vmatpush.bf16.msra.mxu1 %v1426_v8  ;;  %877 = vmatpush.bf16.msra.mxu2 %v1438_v12 }
 0x300   :  { %v655_v2 = vpop.f32.mrf.mxu0 }
 0x301   :  { %v659_v1 = vadd.f32 %v655_v2, %v623_v62  ;;  %v669_v3 = vpop.f32.mrf.mxu1 }
 0x302   :  { %v673_v8 = vadd.f32 %v669_v3, %v625_v11 }
 0x303   :  { %v692_v4 = vmul.f32 0.5, %v659_v1 }
 0x305   :  { %1119 = vtanh.f32 %v692_v4 }
 0x306   :  { %v641_v5 = vpop.f32.mrf.mxu3 }
 0x307   :  { %v645_v13 = vadd.f32 %v641_v5, %v621_v9  ;;  %v683_v10 = vpop.f32.mrf.mxu2 }
 0x308   :  { %v657_v16 = vpop.f32.mrf.mxu0  ;;  %v687_v7 = vadd.f32 %v683_v10, %v627_v15 }
 0x309   :  { %v688_v17 = vmul.f32 0.5, %v645_v13  ;;  %v671_v6 = vpop.f32.mrf.mxu1 }
 0x30a   :  { %v697_v20 = vmul.f32 0.5, %v687_v7 }
 0x30b   :  { %v1120_v18 = vpop.eup %1119  ;;  %1121 = vtanh.f32 %v688_v17 }
 0x30c   :  { %v694_v12 = vmul.f32 0.5, %v1120_v18  ;;  %1123 = vtanh.f32 %v673_v8  ;;  %v817_v18 = vld [vmem:[#allocation4 + $0x28] sm:$0xff] }
 0x30d   :  { %1125 = vtanh.f32 %v697_v20 }
 0x30e   :  { %v643_v21 = vpop.f32.mrf.mxu3  ;;  %v695_v24 = vadd.f32 0.5, %v694_v12 }
 0x30f   :  { %v685_v22 = vpop.f32.mrf.mxu2 }
 0x310   :  { %v701_v29 = vmul.f32 %v695_v24, %v617_v55 }
 0x311   :  { %v1122_v23 = vpop.eup %1121 }
 0x312   :  { %v690_v26 = vmul.f32 0.5, %v1122_v23  ;;  %v1124_v28 = vpop.eup %1123  ;;  %v823_v23 = vld [vmem:[#allocation7 + $0x28] sm:$0xff] }
 0x313   :  { %v1126_v31 = vpop.eup %1125 }
 0x314   :  { %v691_v27 = vadd.f32 0.5, %v690_v26  ;;  %v699_v34 = vmul.f32 0.5, %v1126_v31  ;;  %v821_v26 = vld [vmem:[#allocation6 + $0x28] sm:$0xff] }
 0x316   :  { %v702_v30 = vmul.f32 %v1124_v28, %v691_v27  ;;  %v700_v35 = vadd.f32 0.5, %v699_v34 }
 0x318   :  { %v703_v32 = vadd.f32 %v702_v30, %v701_v29 }
 0x31a   :  { %1127 = vtanh.f32 %v703_v32  ;;  %v715_v33 = vsel %vm713_vm10, %v703_v32, %v617_v55 }
 0x320   :  { %v1128_v36 = vpop.eup %1127 }
 0x321   :  { %v705_v37 = vmul.f32 %v1128_v36, %v700_v35 }
 0x323   :  { %v714_v38 = vsel %vm713_vm10, %v705_v37, %v616_v63 }
 0x324   :  { %717 = vst.msk [vmem:[#allocation16 + $0x18] sm:$0xff] %vm98_vm0, %v714_v38  ;;  %v726_v39 = vpack.c.bf16 %v714_v38, %v714_v38 }
 0x326   :  { %1048 = vmatmul.msk.bf16.vlgmr.msra.gmra.mxu3 %vm98_vm0, %v726_v39  ;;  %1049 = vmatmul.msk.bf16.vlgmr.msrb.gmra.mxu0 %vm98_vm0, %v726_v39 }
 0x327   :  { %1050 = vmatmul.msk.bf16.vlgmr.msrb.gmra.mxu1 %vm98_vm0, %v726_v39  ;;  %1051 = vmatmul.msk.bf16.vlgmr.msrb.gmra.mxu2 %vm98_vm0, %v726_v39  ;;  %v908_v39 = vpop.permute.xlu0 %907 }
 0x328   :  { %vm909_vm12 = vcmp.eq.s32.totalorder %v908_v39, 1 }
 0x3a3   :  { %v753_v41 = vpop.f32.mrf.mxu0 }
 0x3a4   :  { %v757_v42 = vadd.f32 %v753_v41, %v721_v40  ;;  %v767_v43 = vpop.f32.mrf.mxu1 }
 0x3a5   :  { %v771_v55 = vadd.f32 %v767_v43, %v723_v51 }
 0x3a6   :  { %v790_v19 = vmul.f32 0.5, %v757_v42 }
 0x3a8   :  { %1129 = vtanh.f32 %v790_v19 }
 0x3a9   :  { %v739_v45 = vpop.f32.mrf.mxu3 }
 0x3aa   :  { %v743_v14 = vadd.f32 %v739_v45, %v719_v44  ;;  %v781_v46 = vpop.f32.mrf.mxu2 }
 0x3ab   :  { %v755_v47 = vpop.f32.mrf.mxu0  ;;  %v785_v52 = vadd.f32 %v781_v46, %v725_v49 }
 0x3ac   :  { %v786_v48 = vmul.f32 0.5, %v743_v14  ;;  %v769_v50 = vpop.f32.mrf.mxu1 }
 0x3ad   :  { %v795_v57 = vmul.f32 0.5, %v785_v52 }
 0x3ae   :  { %v1130_v53 = vpop.eup %1129  ;;  %1131 = vtanh.f32 %v786_v48 }
 0x3af   :  { %v792_v56 = vmul.f32 0.5, %v1130_v53  ;;  %1133 = vtanh.f32 %v771_v55 }
 0x3b0   :  { %1135 = vtanh.f32 %v795_v57 }
 0x3b1   :  { %v741_v58 = vpop.f32.mrf.mxu3  ;;  %v793_v61 = vadd.f32 0.5, %v792_v56 }
 0x3b2   :  { %v783_v59 = vpop.f32.mrf.mxu2 }
 0x3b3   :  { %v799_v62 = vmul.f32 %v793_v61, %v715_v33 }
 0x3b4   :  { %v1132_v60 = vpop.eup %1131 }
 0x3b5   :  { %v788_v63 = vmul.f32 0.5, %v1132_v60  ;;  %v1134_v54 = vpop.eup %1133 }
 0x3b6   :  { %v1136_v1 = vpop.eup %1135 }
 0x3b7   :  { %v789_v0 = vadd.f32 0.5, %v788_v63  ;;  %v797_v9 = vmul.f32 0.5, %v1136_v1 }
 0x3b9   :  { %v800_v2 = vmul.f32 %v1134_v54, %v789_v0  ;;  %v798_v5 = vadd.f32 0.5, %v797_v9 }
 0x3bb   :  { %v801_v3 = vadd.f32 %v800_v2, %v799_v62 }
 0x3bd   :  { %1137 = vtanh.f32 %v801_v3  ;;  %v813_v4 = vsel %vm811_vm11, %v801_v3, %v715_v33 }
 0x3c3   :  { %v1138_v13 = vpop.eup %1137 }
 0x3c4   :  { %v803_v10 = vmul.f32 %v1138_v13, %v798_v5 }
 0x3c6   :  { %v1614_v16 = vsel %vm811_vm11, %v803_v10, %v714_v38 }
 0x3c7   :  { %815 = vst.msk [vmem:[#allocation16 + $0x20] sm:$0xff] %vm98_vm0, %v1614_v16  ;;  %v824_v17 = vpack.c.bf16 %v1614_v16, %v1614_v16 }
 0x3c9   :  { %1053 = vmatmul.msk.bf16.vlgmr.msrb.gmra.mxu3 %vm98_vm0, %v824_v17  ;;  %1054 = vmatmul.msk.bf16.vlgmr.msra.gmra.mxu0 %vm98_vm0, %v824_v17 }
 0x3ca   :  { %1055 = vmatmul.msk.bf16.vlgmr.msra.gmra.mxu1 %vm98_vm0, %v824_v17  ;;  %1056 = vmatmul.msk.bf16.vlgmr.msra.gmra.mxu2 %vm98_vm0, %v824_v17 }
 0x446   :  { %v851_v15 = vpop.f32.mrf.mxu0 }
 0x447   :  { %v855_v6 = vadd.f32 %v851_v15, %v819_v25  ;;  %v865_v11 = vpop.f32.mrf.mxu1 }
 0x448   :  { %v869_v29 = vadd.f32 %v865_v11, %v821_v26 }
 0x449   :  { %v888_v7 = vmul.f32 0.5, %v855_v6 }
 0x44b   :  { %1139 = vtanh.f32 %v888_v7 }
 0x44c   :  { %v837_v8 = vpop.f32.mrf.mxu3 }
 0x44d   :  { %v841_v12 = vadd.f32 %v837_v8, %v817_v18  ;;  %v879_v20 = vpop.f32.mrf.mxu2 }
 0x44e   :  { %v853_v21 = vpop.f32.mrf.mxu0  ;;  %v883_v27 = vadd.f32 %v879_v20, %v823_v23 }
 0x44f   :  { %v884_v22 = vmul.f32 0.5, %v841_v12  ;;  %v867_v24 = vpop.f32.mrf.mxu1 }
 0x450   :  { %v893_v31 = vmul.f32 0.5, %v883_v27 }
 0x451   :  { %v1140_v28 = vpop.eup %1139  ;;  %1141 = vtanh.f32 %v884_v22 }
 0x452   :  { %v890_v30 = vmul.f32 0.5, %v1140_v28  ;;  %1143 = vtanh.f32 %v869_v29 }
 0x453   :  { %1145 = vtanh.f32 %v893_v31 }
 0x454   :  { %v839_v32 = vpop.f32.mrf.mxu3  ;;  %v891_v35 = vadd.f32 0.5, %v890_v30 }
 0x455   :  { %v881_v33 = vpop.f32.mrf.mxu2 }
 0x456   :  { %v897_v40 = vmul.f32 %v891_v35, %v813_v4 }
 0x457   :  { %v1142_v34 = vpop.eup %1141 }
 0x458   :  { %v886_v36 = vmul.f32 0.5, %v1142_v34  ;;  %v1144_v38 = vpop.eup %1143 }
 0x459   :  { %v1146_v42 = vpop.eup %1145 }
 0x45a   :  { %v887_v37 = vadd.f32 0.5, %v886_v36  ;;  %v895_v44 = vmul.f32 0.5, %v1146_v42 }
 0x45c   :  { %v898_v41 = vmul.f32 %v1144_v38, %v887_v37  ;;  %v896_v45 = vadd.f32 0.5, %v895_v44 }
 0x45e   :  { %v899_v43 = vadd.f32 %v898_v41, %v897_v40 }
 0x460   :  { %1147 = vtanh.f32 %v899_v43  ;;  %v911_v19 = vsel %vm909_vm12, %v899_v43, %v813_v4 }
 0x461   :  { %915 = vst.msk [vmem:[#allocation3] sm:$0xff] %vm98_vm0, %v911_v19 }
 0x462   :  { %920 = vst.msk [vmem:[#allocation19] sm:$0xff] %vm98_vm0, %v911_v19 }
 0x466   :  { %v1148_v14 = vpop.eup %1147 }
 0x467   :  { %v901_v46 = vmul.f32 %v1148_v14, %v896_v45 }
 0x469   :  { %v910_v47 = vsel %vm909_vm12, %v901_v46, %v1614_v16 }
 0x46a   :  { %913 = vst.msk [vmem:[#allocation16 + $0x28] sm:$0xff] %vm98_vm0, %v910_v47 }
 0x46b   :  { %914 = vst.msk [vmem:[#allocation2] sm:$0xff] %vm98_vm0, %v910_v47  ;;  %933 = dma.vmem_to_hbm [thread:$0]  %s926_s6, 768, %s928_s15, [#allocation10], %s1339_s7, %s1339_s7, %s1340_s8  }
 0x46c   :  { %919 = vst.msk [vmem:[#allocation17] sm:$0xff] %vm98_vm0, %v910_v47 }
 0x46d   :  { %944 = dma.vmem_to_hbm [thread:$0]  %s940_s17, 128, %s942_s20, [#allocation18]  }
 0x46e   :  { %955 = dma.vmem_to_hbm [thread:$0]  %s951_s21, 128, %s953_s24, [#allocation18]  }
 0x46f   :  { %1323 = dma.done.wait [#allocation10], 768  }
 0x470   :  { %1324 = vsyncadd [#allocation10], 4294966528 }
 0x471   :  { %1325 = dma.done.wait [#allocation18], 256  }
 0x472   :  { %1326 = vsyncadd [#allocation18], 4294967040 }
 0x473   :  { %968 = vsyncpa [#allocation9], 1 }
 0x474   :  { %969 = vsyncpa [#allocation12], 1 }
 0x475   :  { %970 = vsyncpa [#allocation15], 1 }
 0x476   :  { %971 = vsyncpa [#allocation10], 1 }
 0x477   :  { %972 = vsyncpa [#allocation18], 1 }

</bundles_post_ra>
